<compile_context>
chip_gen: v7x
topology: tpu7x:2x2x1
jax: 0.10.0
libtpu: 0.0.40
codegen_flags: <defaults>
</compile_context>

<pallas_src>
import functools

import jax
import jax.numpy as jnp
from jax.experimental import pallas as pl
from jax.experimental.pallas import tpu as pltpu


_VMEM_LIMIT = 32 * 1024 * 1024   # safe headroom on v5e/v6e (128 MiB) and v7x (64 MiB)
_NEG_BIG = -1e9                  # additive mask value (finite)
_INIT_M = -1e30                  # online-softmax running-max init (finite)


def _leaky(x, slope):
    # single VPU max instead of cmp+mul+select
    return jnp.maximum(x, slope * x)


# --------------------------------------------------------------------------
# Kernel 1: feature projection + fused attention-coefficient matmul
# --------------------------------------------------------------------------
def _proj_kernel(x_ref, w_ref, ab_ref, h_ref, alpha_ref, *, heads, out_ch):
    xb = x_ref[...].astype(jnp.bfloat16)
    h = jnp.dot(xb, w_ref[...], preferred_element_type=jnp.float32)      # [TM, H*C] f32
    hb = h.astype(jnp.bfloat16)                                          # cast ONCE
    # one matmul for both a_src and a_dst coefficients  -> [TM, 2H]
    alpha_ref[...] = jnp.dot(hb, ab_ref[...], preferred_element_type=jnp.float32)
    # head-major bf16 slab for the attention kernel
    for hh in range(heads):
        h_ref[hh] = hb[:, hh * out_ch:(hh + 1) * out_ch]


# --------------------------------------------------------------------------
# Kernel 2: masked attention softmax + aggregation
#   flash-style online softmax, block-sparse over source tiles via scalar
#   prefetch (cnt_ref / ids_ref live in SMEM).
# --------------------------------------------------------------------------
def _attn_kernel(cnt_ref, ids_ref, a_dst_ref, a_srcT_ref, h_ref, mask_ref,
                 bias_ref, o_ref, m_sc, l_sc, acc_sc,
                 *, heads, out_ch, out_slope):
    i = pl.program_id(0)
    k = pl.program_id(1)
    nk = pl.num_programs(1)

    @pl.when(k == 0)
    def _():
        m_sc[...] = jnp.full_like(m_sc, _INIT_M)
        l_sc[...] = jnp.zeros_like(l_sc)
        acc_sc[...] = jnp.zeros_like(acc_sc)

    # Only occupied source tiles do any work; skipped steps also re-use the
    # previous block index in every data-dependent index_map, so they cost no
    # DMA either.
    @pl.when(k < cnt_ref[i])
    def _():
        a_dst = a_dst_ref[...]                            # [TM, H]  f32
        a_srcT = a_srcT_ref[...]                          # [H, TK]  f32
        # int8 0/1 adjacency -> additive 0 / -1e9 mask, once per tile
        mvalid = mask_ref[...].astype(jnp.float32)        # [TM, TK] 0/1
        madd = (mvalid - 1.0) * jnp.float32(-_NEG_BIG)    # 1 -> 0, 0 -> -1e9

        for hh in range(heads):
            e = a_dst[:, hh:hh + 1] + a_srcT[hh:hh + 1, :]        # [TM, TK]
            e = _leaky(e, 0.2) + madd                             # GAT slope + mask
            m_prev = m_sc[hh]                                     # [TM, 1]
            m_new = jnp.maximum(m_prev, jnp.max(e, axis=-1, keepdims=True))
            corr = jnp.exp(m_prev - m_new)
            p = jnp.exp(e - m_new)                                # unnormalized weights
            l_sc[hh] = corr * l_sc[hh] + jnp.sum(p, axis=-1, keepdims=True)
            acc_sc[hh] = corr * acc_sc[hh] + jnp.dot(
                p.astype(jnp.bfloat16), h_ref[hh],
                preferred_element_type=jnp.float32)               # [TM, C]
            m_sc[hh] = m_new

    @pl.when(k == nk - 1)
    def _():
        bias = bias_ref[...]                                      # [1, H*C]
        for hh in range(heads):
            inv_l = pl.reciprocal(l_sc[hh], approx=False)         # exact; epilogue only
            seg = acc_sc[hh] * inv_l + bias[:, hh * out_ch:(hh + 1) * out_ch]
            seg = _leaky(seg, out_slope)                          # outer LeakyReLU
            o_ref[:, hh * out_ch:(hh + 1) * out_ch] = seg.astype(o_ref.dtype)


# --------------------------------------------------------------------------
# Kernel 3: global mean pool + MLP head, gridded over row tiles
# --------------------------------------------------------------------------
def _pool_mlp_kernel(pool_ref, x_ref, wf1_ref, bf1_ref, wf2_ref, bf2_ref,
                     out_ref, acc_sc):
    t = pl.program_id(0)
    nt = pl.num_programs(0)

    @pl.when(t == 0)
    def _():
        acc_sc[...] = jnp.zeros_like(acc_sc)

    acc_sc[...] += jnp.dot(pool_ref[...].astype(jnp.float32), x_ref[...],
                           preferred_element_type=jnp.float32)    # [G, 32] partial

    @pl.when(t == nt - 1)
    def _():
        pooled = acc_sc[...]
        hmid = jnp.dot(pooled, wf1_ref[...],
                       preferred_element_type=jnp.float32) + bf1_ref[...]
        hmid = _leaky(hmid, 0.01)
        logit = jnp.dot(hmid, wf2_ref[...],
                        preferred_element_type=jnp.float32) + bf2_ref[...]
        out_ref[...] = jax.nn.sigmoid(logit)                      # [G, 1]


# --------------------------------------------------------------------------
# GAT layer wrapper
# --------------------------------------------------------------------------
def _gat_layer(x, mask_i8, counts, tile_ids, w_bf16, ab_bf16, bias, *,
               heads, out_ch, out_slope, out_dtype, tile):
    n_pad, f_in = x.shape
    hc = heads * out_ch
    n_tiles = n_pad // tile
    nst = n_tiles    # source-tile axis extent (closure for index_maps)

    h3, alpha = pl.pallas_call(
        functools.partial(_proj_kernel, heads=heads, out_ch=out_ch),
        grid=(n_tiles,),
        in_specs=[pl.BlockSpec((tile, f_in), lambda i: (i, 0)),
                  pl.BlockSpec((f_in, hc), lambda i: (0, 0)),
                  pl.BlockSpec((hc, 2 * heads), lambda i: (0, 0))],
        out_specs=[pl.BlockSpec((heads, tile, out_ch), lambda i: (0, i, 0)),
                   pl.BlockSpec((tile, 2 * heads), lambda i: (i, 0))],
        out_shape=(jax.ShapeDtypeStruct((heads, n_pad, out_ch), jnp.bfloat16),
                   jax.ShapeDtypeStruct((n_pad, 2 * heads), jnp.float32)),
        compiler_params=pltpu.CompilerParams(
            dimension_semantics=("parallel",),
            vmem_limit_bytes=_VMEM_LIMIT),
    )(x, w_bf16, ab_bf16)

    a_src_t = alpha[:, :heads].T      # [H, N_pad] -- one tiny transpose, in XLA
    a_dst = alpha[:, heads:]          # [N_pad, H]

    grid_spec = pltpu.PrefetchScalarGridSpec(
        num_scalar_prefetch=2,        # counts [nrt], tile_ids [nrt*nst] (SMEM)
        grid=(n_tiles, n_tiles),      # (dest row tiles, packed source-tile steps)
        in_specs=[
            pl.BlockSpec((tile, heads), lambda i, k, cnt, ids: (i, 0)),
            pl.BlockSpec((heads, tile),
                         lambda i, k, cnt, ids: (0, ids[i * nst + k])),
            pl.BlockSpec((heads, tile, out_ch),
                         lambda i, k, cnt, ids: (0, ids[i * nst + k], 0)),
            pl.BlockSpec((tile, tile),
                         lambda i, k, cnt, ids: (i, ids[i * nst + k])),
            pl.BlockSpec((1, hc), lambda i, k, cnt, ids: (0, 0)),
        ],
        out_specs=pl.BlockSpec((tile, hc), lambda i, k, cnt, ids: (i, 0)),
        scratch_shapes=[pltpu.VMEM((heads, tile, 1), jnp.float32),       # running max
                        pltpu.VMEM((heads, tile, 1), jnp.float32),       # running sum
                        pltpu.VMEM((heads, tile, out_ch), jnp.float32)], # accumulator
    )

    out = pl.pallas_call(
        functools.partial(_attn_kernel, heads=heads, out_ch=out_ch,
                          out_slope=out_slope),
        grid_spec=grid_spec,
        out_shape=jax.ShapeDtypeStruct((n_pad, hc), out_dtype),
        compiler_params=pltpu.CompilerParams(
            dimension_semantics=("parallel", "arbitrary"),
            vmem_limit_bytes=_VMEM_LIMIT),
    )(counts, tile_ids, a_dst, a_src_t, h3, mask_i8, bias)
    return out


# --------------------------------------------------------------------------
# Parameters / full forward
# --------------------------------------------------------------------------
def _expand_att(att, heads, out_ch):
    """att: [heads, out_ch] -> block matrix [heads*out_ch, heads] so that
    (h @ M)[n, hh] = <h_head_hh[n], att[hh]>."""
    m = jnp.zeros((heads * out_ch, heads), jnp.float32)
    for hh in range(heads):
        m = m.at[hh * out_ch:(hh + 1) * out_ch, hh].set(att[hh])
    return m


def init_params(key, input_dim, heads1=4, c1=64, c2=32):
    ks = jax.random.split(key, 12)
    s = 0.1
    return {
        "w1": s * jax.random.normal(ks[0], (input_dim, heads1 * c1), jnp.float32),
        "att_src1": s * jax.random.normal(ks[1], (heads1, c1), jnp.float32),
        "att_dst1": s * jax.random.normal(ks[2], (heads1, c1), jnp.float32),
        "b1": s * jax.random.normal(ks[3], (1, heads1 * c1), jnp.float32),
        "w2": s * jax.random.normal(ks[4], (heads1 * c1, c2), jnp.float32),
        "att_src2": s * jax.random.normal(ks[5], (1, c2), jnp.float32),
        "att_dst2": s * jax.random.normal(ks[6], (1, c2), jnp.float32),
        "b2": s * jax.random.normal(ks[7], (1, c2), jnp.float32),
        "wf1": s * jax.random.normal(ks[8], (c2, 16), jnp.float32),
        "bf1": s * jax.random.normal(ks[9], (1, 16), jnp.float32),
        "wf2": s * jax.random.normal(ks[10], (16, 1), jnp.float32),
        "bf2": s * jax.random.normal(ks[11], (1, 1), jnp.float32),
    }


def team_evaluator_forward(x, edge_index, batch, num_graphs, params,
                           heads1=4, c1=64, c2=32, tile=512):
    x = jnp.asarray(x, jnp.float32)
    edge_index = jnp.asarray(edge_index, jnp.int32)
    batch = jnp.asarray(batch, jnp.int32)

    N, f_in = x.shape
    G = int(num_graphs)
    n_pad = ((N + tile - 1) // tile) * tile
    n_tiles = n_pad // tile

    # padded node features
    x_p = jnp.zeros((n_pad, f_in), jnp.float32).at[:N, :].set(x)

    src, dst = edge_index[0], edge_index[1]        # edge j -> i  (src=j, dst=i)

    # Dense int8 0/1 adjacency (edges + self loops), built directly in its
    # compact dtype; shared by BOTH GAT layers.
    # TODO(synk): a truly sparse (edge-list) GAT would need a scalar-prefetch
    # gather kernel; the dense mask remains quadratic in N.
    diag = jnp.arange(n_pad, dtype=jnp.int32)
    adj_i8 = jnp.zeros((n_pad, n_pad), jnp.int8)
    adj_i8 = adj_i8.at[dst, src].set(1)
    adj_i8 = adj_i8.at[diag, diag].set(1)          # self loops (also pad rows -> finite)

    # Block-sparse tile metadata (O(E) scatter + diagonal): for each dest row
    # tile, the packed list of occupied source tiles; the tail repeats the last
    # valid id so skipped grid steps keep the same block index (no re-DMA).
    occ = jnp.zeros((n_tiles, n_tiles), jnp.int32)
    occ = occ.at[dst // tile, src // tile].set(1)
    tdiag = jnp.arange(n_tiles, dtype=jnp.int32)
    occ = occ.at[tdiag, tdiag].set(1)                               # counts >= 1
    counts = occ.sum(axis=1).astype(jnp.int32)                      # [n_tiles]
    order = jnp.argsort(1 - occ, axis=1).astype(jnp.int32)          # occupied first
    pos = jnp.minimum(jnp.arange(n_tiles, dtype=jnp.int32)[None, :],
                      counts[:, None] - 1)
    tile_ids = jnp.take_along_axis(order, pos, axis=1).reshape(-1).astype(jnp.int32)

    # mean-pool membership matrix (bf16; padded nodes belong to no graph)
    batch_p = jnp.full((n_pad,), G, jnp.int32).at[:N].set(batch)
    onehot = (batch_p[None, :] == jnp.arange(G, dtype=jnp.int32)[:, None]
              ).astype(jnp.float32)
    pool = (onehot / jnp.maximum(onehot.sum(axis=1, keepdims=True), 1.0)
            ).astype(jnp.bfloat16)

    # fused attention-coefficient matrices  [H*C, 2H] = [a_src | a_dst]
    ab1 = jnp.concatenate([_expand_att(params["att_src1"], heads1, c1),
                           _expand_att(params["att_dst1"], heads1, c1)], axis=1)
    ab2 = jnp.concatenate([_expand_att(params["att_src2"], 1, c2),
                           _expand_att(params["att_dst2"], 1, c2)], axis=1)

    # GAT layer 1 (heads=4, concat) + outer LeakyReLU(0.01); bf16 activations
    x1 = _gat_layer(x_p, adj_i8, counts, tile_ids,
                    params["w1"].astype(jnp.bfloat16), ab1.astype(jnp.bfloat16),
                    params["b1"], heads=heads1, out_ch=c1, out_slope=0.01,
                    out_dtype=jnp.bfloat16, tile=tile)

    # GAT layer 2 (heads=1) + outer LeakyReLU(0.01); f32 out for the head
    x2 = _gat_layer(x1, adj_i8, counts, tile_ids,
                    params["w2"].astype(jnp.bfloat16), ab2.astype(jnp.bfloat16),
                    params["b2"], heads=1, out_ch=c2, out_slope=0.01,
                    out_dtype=jnp.float32, tile=tile)

    # global_mean_pool (accumulated over row tiles) + MLP head
    out = pl.pallas_call(
        _pool_mlp_kernel,
        grid=(n_tiles,),
        in_specs=[pl.BlockSpec((G, tile), lambda t: (0, t)),
                  pl.BlockSpec((tile, c2), lambda t: (t, 0)),
                  pl.BlockSpec((c2, 16), lambda t: (0, 0)),
                  pl.BlockSpec((1, 16), lambda t: (0, 0)),
                  pl.BlockSpec((16, 1), lambda t: (0, 0)),
                  pl.BlockSpec((1, 1), lambda t: (0, 0))],
        out_specs=pl.BlockSpec((G, 1), lambda t: (0, 0)),
        out_shape=jax.ShapeDtypeStruct((G, 1), jnp.float32),
        scratch_shapes=[pltpu.VMEM((G, c2), jnp.float32)],
        compiler_params=pltpu.CompilerParams(
            dimension_semantics=("arbitrary",),
            vmem_limit_bytes=_VMEM_LIMIT),
    )(pool, x2, params["wf1"], params["bf1"], params["wf2"], params["bf2"])
    return out.squeeze()   # matches .squeeze() in the PyTorch module


if __name__ == "__main__":
    key = jax.random.PRNGKey(0)
    k_x, k_p = jax.random.split(key)

    input_dim = 16
    nodes_per_graph = 4
    num_graphs = 2
    N = nodes_per_graph * num_graphs

    # Node features
    x = jax.random.normal(k_x, (N, input_dim), jnp.float32)

    # Two small graphs, each a bidirectional ring over its 4 nodes
    src, dst = [], []
    for g in range(num_graphs):
        off = g * nodes_per_graph
        for i in range(nodes_per_graph):
            j = (i + 1) % nodes_per_graph
            src += [off + i, off + j]
            dst += [off + j, off + i]
    edge_index = jnp.array([src, dst], dtype=jnp.int32)  # [2, E]

    batch = jnp.repeat(jnp.arange(num_graphs, dtype=jnp.int32), nodes_per_graph)

    params = init_params(k_p, input_dim)

    out = team_evaluator_forward(x, edge_index, batch, num_graphs, params)
    jax.block_until_ready(out)
    assert out.shape == (num_graphs,)
    assert bool(jnp.all(jnp.isfinite(out)))
    print("KERNEL_OK")
</pallas_src>

<mosaic_0001>
module attributes {stable_mosaic.version = 11 : i64} {
  func.func @_proj_kernel(%arg0: i32, %arg1: memref<512x16xf32, #tpu.memory_space<vmem>>, %arg2: memref<16x256xbf16, #tpu.memory_space<vmem>>, %arg3: memref<256x8xbf16, #tpu.memory_space<vmem>>, %arg4: memref<4x512x64xbf16, #tpu.memory_space<vmem>>, %arg5: memref<512x8xf32, #tpu.memory_space<vmem>>) attributes {dimension_semantics = [#tpu.dimension_semantics<parallel>], iteration_bounds = array<i64: 1>, scalar_prefetch = 0 : i64, scratch_operands = 0 : i64, tpu.core_type = #tpu.core_type<tc>, window_params = [{transform_indices = @transform_0, window_bounds = array<i64: 512, 16>}, {pipeline_mode = #tpu.pipeline_mode<synchronous>, transform_indices = @transform_1, window_bounds = array<i64: 16, 256>}, {pipeline_mode = #tpu.pipeline_mode<synchronous>, transform_indices = @transform_2, window_bounds = array<i64: 256, 8>}, {transform_indices = @transform_3, window_bounds = array<i64: 4, 512, 64>}, {transform_indices = @transform_4, window_bounds = array<i64: 512, 8>}]} {
    %c0 = arith.constant 0 : index
    %c0_0 = arith.constant 0 : index
    %0 = vector.load %arg1[%c0, %c0_0] : memref<512x16xf32, #tpu.memory_space<vmem>>, vector<512x16xf32>
    %1 = arith.truncf %0 : vector<512x16xf32> to vector<512x16xbf16>
    %c0_1 = arith.constant 0 : index
    %c0_2 = arith.constant 0 : index
    %2 = vector.load %arg2[%c0_1, %c0_2] : memref<16x256xbf16, #tpu.memory_space<vmem>>, vector<16x256xbf16>
    %cst = arith.constant dense<0.000000e+00> : vector<512x256xf32>
    %3 = tpu.matmul %1, %2, %cst {dimension_numbers = #tpu.dot_dimension_numbers<[1], [0], [0], [1], [0, 0, 1, 1], [], []>} : vector<512x16xbf16>, vector<16x256xbf16>, vector<512x256xf32> -> vector<512x256xf32>
    %4 = arith.truncf %3 : vector<512x256xf32> to vector<512x256xbf16>
    %c0_3 = arith.constant 0 : index
    %c0_4 = arith.constant 0 : index
    %5 = vector.load %arg3[%c0_3, %c0_4] : memref<256x8xbf16, #tpu.memory_space<vmem>>, vector<256x8xbf16>
    %cst_5 = arith.constant dense<0.000000e+00> : vector<512x8xf32>
    %6 = tpu.matmul %4, %5, %cst_5 {dimension_numbers = #tpu.dot_dimension_numbers<[1], [0], [0], [1], [0, 0, 1, 1], [], []>} : vector<512x256xbf16>, vector<256x8xbf16>, vector<512x8xf32> -> vector<512x8xf32>
    %c0_6 = arith.constant 0 : index
    %c0_7 = arith.constant 0 : index
    %7 = vector.load %arg5[%c0_6, %c0_7] : memref<512x8xf32, #tpu.memory_space<vmem>>, vector<512x8xf32>
    tpu.vector_store %arg5[%c0_6, %c0_7], %6 {strides = array<i32>} : memref<512x8xf32, #tpu.memory_space<vmem>>, vector<512x8xf32>,
    %8 = vector.extract_strided_slice %4 {offsets = [0, 0], sizes = [512, 64], strides = [1, 1]} : vector<512x256xbf16> to vector<512x64xbf16>
    %c0_8 = arith.constant 0 : index
    %c0_9 = arith.constant 0 : index
    %c0_10 = arith.constant 0 : index
    %9 = vector.load %arg4[%c0_8, %c0_9, %c0_10] : memref<4x512x64xbf16, #tpu.memory_space<vmem>>, vector<1x512x64xbf16>
    %10 = vector.shape_cast %9 : vector<1x512x64xbf16> to vector<512x64xbf16>
    %11 = vector.shape_cast %8 : vector<512x64xbf16> to vector<1x512x64xbf16>
    tpu.vector_store %arg4[%c0_8, %c0_9, %c0_10], %11 {strides = array<i32>} : memref<4x512x64xbf16, #tpu.memory_space<vmem>>, vector<1x512x64xbf16>,
    %12 = vector.extract_strided_slice %4 {offsets = [0, 64], sizes = [512, 64], strides = [1, 1]} : vector<512x256xbf16> to vector<512x64xbf16>
    %c1 = arith.constant 1 : index
    %c0_11 = arith.constant 0 : index
    %c0_12 = arith.constant 0 : index
    %13 = vector.load %arg4[%c1, %c0_11, %c0_12] : memref<4x512x64xbf16, #tpu.memory_space<vmem>>, vector<1x512x64xbf16>
    %14 = vector.shape_cast %13 : vector<1x512x64xbf16> to vector<512x64xbf16>
    %15 = vector.shape_cast %12 : vector<512x64xbf16> to vector<1x512x64xbf16>
    tpu.vector_store %arg4[%c1, %c0_11, %c0_12], %15 {strides = array<i32>} : memref<4x512x64xbf16, #tpu.memory_space<vmem>>, vector<1x512x64xbf16>,
    %16 = vector.extract_strided_slice %4 {offsets = [0, 128], sizes = [512, 64], strides = [1, 1]} : vector<512x256xbf16> to vector<512x64xbf16>
    %c2 = arith.constant 2 : index
    %c0_13 = arith.constant 0 : index
    %c0_14 = arith.constant 0 : index
    %17 = vector.load %arg4[%c2, %c0_13, %c0_14] : memref<4x512x64xbf16, #tpu.memory_space<vmem>>, vector<1x512x64xbf16>
    %18 = vector.shape_cast %17 : vector<1x512x64xbf16> to vector<512x64xbf16>
    %19 = vector.shape_cast %16 : vector<512x64xbf16> to vector<1x512x64xbf16>
    tpu.vector_store %arg4[%c2, %c0_13, %c0_14], %19 {strides = array<i32>} : memref<4x512x64xbf16, #tpu.memory_space<vmem>>, vector<1x512x64xbf16>,
    %20 = vector.extract_strided_slice %4 {offsets = [0, 192], sizes = [512, 64], strides = [1, 1]} : vector<512x256xbf16> to vector<512x64xbf16>
    %c3 = arith.constant 3 : index
    %c0_15 = arith.constant 0 : index
    %c0_16 = arith.constant 0 : index
    %21 = vector.load %arg4[%c3, %c0_15, %c0_16] : memref<4x512x64xbf16, #tpu.memory_space<vmem>>, vector<1x512x64xbf16>
    %22 = vector.shape_cast %21 : vector<1x512x64xbf16> to vector<512x64xbf16>
    %23 = vector.shape_cast %20 : vector<512x64xbf16> to vector<1x512x64xbf16>
    tpu.vector_store %arg4[%c3, %c0_15, %c0_16], %23 {strides = array<i32>} : memref<4x512x64xbf16, #tpu.memory_space<vmem>>, vector<1x512x64xbf16>,
    return
  }
  func.func @transform_0(%arg0: i32) -> (i32, i32) {
    %c0_i32 = arith.constant 0 : i32
    %c0_i32_0 = arith.constant 0 : i32
    return %arg0, %c0_i32 : i32, i32
  }
  func.func @transform_1(%arg0: i32) -> (i32, i32) {
    %c0_i32 = arith.constant 0 : i32
    %c0_i32_0 = arith.constant 0 : i32
    %c0_i32_1 = arith.constant 0 : i32
    return %c0_i32, %c0_i32_0 : i32, i32
  }
  func.func @transform_2(%arg0: i32) -> (i32, i32) {
    %c0_i32 = arith.constant 0 : i32
    %c0_i32_0 = arith.constant 0 : i32
    %c0_i32_1 = arith.constant 0 : i32
    return %c0_i32, %c0_i32_0 : i32, i32
  }
  func.func @transform_3(%arg0: i32) -> (i32, i32, i32) {
    %c0_i32 = arith.constant 0 : i32
    %c0_i32_0 = arith.constant 0 : i32
    %c0_i32_1 = arith.constant 0 : i32
    return %c0_i32, %arg0, %c0_i32_0 : i32, i32, i32
  }
  func.func @transform_4(%arg0: i32) -> (i32, i32) {
    %c0_i32 = arith.constant 0 : i32
    %c0_i32_0 = arith.constant 0 : i32
    return %arg0, %c0_i32 : i32, i32
  }
}

</mosaic_0001>

<bundles_post_ra>
// kernel: tpu_custom_call.1
= control target key start
LH: loop header
LB: loop body
LE: loop exit
PB: predicated region body
PF: predicated region fallthrough
CT: control target
= control target key end

     0   :  { %v2772_v1 = vmov 0   ;;  %vm125_vm0 = vcmask 130048   ;;  %vm1345_vm1 = vcmask 519168   ;;  %s2773_s25 = smov 64   ;;  %vm1056_vm2 = vcmask 64512   ;;  %s4627_s1 = inlined_call_operand.vmem [shape: bf16[16,256], index: 1, kind: input, shape index: {}]   ;;  %s4628_s0 = inlined_call_operand.vmem [shape: f32[512,16], index: 0, kind: input, shape index: {}]   ;;  %s4629_s2 = inlined_call_operand.vmem [shape: bf16[256,8], index: 2, kind: input, shape index: {}]   ;;  %s4630_s3 = inlined_call_operand.vmem [shape: bf16[4,512,64], index: 3, kind: output, shape index: {0}]   ;;  %s4631_s4 = inlined_call_operand.vmem [shape: f32[512,8], index: 4, kind: output, shape index: {1}]  }
   0x1   :  { %v2753_v0 = vld [vmem:[%s4627_s1 + $0x4] ss:$8 sps:$4 sm:$0xff]   ;;  %254 = vmatprep.mubr.bf16.mxu0 %v2772_v1  ;;  %2719 = vmatprep.subr.bf16.mxu1 %v2772_v1  ;;  %v2755_v2 = vld [vmem:[%s4627_s1] ss:$8 sps:$4 sm:$0xff]   ;;  %v19_v6 = vld [vmem:[%s4628_s0 + $0x10] sm:$0xff] }
   0x2   :  { %v17_v3 = vld [vmem:[%s4628_s0] sm:$0xff]  ;;  %v18_v4 = vld [vmem:[%s4628_s0 + $0x8] sm:$0xff]  ;;  %222 = vmatprep.subr.bf16.mxu0 %v2753_v0  ;;  %v20_v7 = vld [vmem:[%s4628_s0 + $0x18] sm:$0xff] }
   0x3   :  { %v81_v5 = vpack.c.bf16 %v18_v4, %v17_v3  ;;  %223 = vmatpush1.bf16.msra.mxu0 %v2755_v2  ;;  %v82_v8 = vpack.c.bf16 %v20_v7, %v19_v6  ;;  %v21_v9 = vld [vmem:[%s4628_s0 + $0x20] sm:$0xff]  ;;  %v22_v10 = vld [vmem:[%s4628_s0 + $0x28] sm:$0xff]  ;;  %v23_v12 = vld [vmem:[%s4628_s0 + $0x30] sm:$0xff] }
   0x4   :  { %767 = vmatprep.subr.bf16.mxu0 %v2772_v1  ;;  %v83_v11 = vpack.c.bf16 %v22_v10, %v21_v9  ;;  %v24_v13 = vld [vmem:[%s4628_s0 + $0x38] sm:$0xff]  ;;  %v25_v15 = vld [vmem:[%s4628_s0 + $0x40] sm:$0xff]  ;;  %v26_v16 = vld [vmem:[%s4628_s0 + $0x48] sm:$0xff] }
   0x5   :  { %v84_v14 = vpack.c.bf16 %v24_v13, %v23_v12  ;;  %v85_v17 = vpack.c.bf16 %v26_v16, %v25_v15  ;;  %v27_v18 = vld [vmem:[%s4628_s0 + $0x50] sm:$0xff]  ;;  %v28_v19 = vld [vmem:[%s4628_s0 + $0x58] sm:$0xff]  ;;  %v29_v21 = vld [vmem:[%s4628_s0 + $0x60] sm:$0xff] }
   0x6   :  { %2223 = vmatmul.mubr.msk.bf16.vlgmr.msra.gmra.mrb[0].mxu0 %vm125_vm0, %v81_v5  ;;  %v86_v20 = vpack.c.bf16 %v28_v19, %v27_v18  ;;  %v30_v22 = vld [vmem:[%s4628_s0 + $0x68] sm:$0xff]  ;;  %v31_v24 = vld [vmem:[%s4628_s0 + $0x70] sm:$0xff]  ;;  %v32_v25 = vld [vmem:[%s4628_s0 + $0x78] sm:$0xff] }
   0x7   :  { %264 = vmatprep.mubr.bf16.mxu0 %v2772_v1  ;;  %v87_v23 = vpack.c.bf16 %v30_v22, %v29_v21  ;;  %v2756_v26 = vld [vmem:[%s4629_s2] sm:$0xff]   ;;  %v2757_v27 = vld [vmem:[%s4629_s2 + $0x8] sm:$0xff]   ;;  %v88_v28 = vpack.c.bf16 %v32_v25, %v31_v24  ;;  %v2758_v29 = vld [vmem:[%s4629_s2 + $0x10] sm:$0xff]  }
   0x8   :  { %2735 = vmatpush1.bf16.msra.mxu1 %v2756_v26  ;;  %768 = vmatpush1.bf16.msra.mxu0 %v2756_v26  ;;  %v33_v30 = vld [vmem:[%s4628_s0 + $0x80] sm:$0xff]  ;;  %v34_v31 = vld [vmem:[%s4628_s0 + $0x88] sm:$0xff]  ;;  %v2759_v32 = vld [vmem:[%s4629_s2 + $0x18] sm:$0xff]  }
   0x9   :  { %2720 = vmatprep.subr.bf16.mxu1 %v2772_v1  ;;  %769 = vmatprep.subr.bf16.mxu0 %v2772_v1  ;;  %v89_v33 = vpack.c.bf16 %v34_v31, %v33_v30  ;;  %v2760_v34 = vld [vmem:[%s4629_s2 + $0x20] sm:$0xff]   ;;  %v35_v35 = vld [vmem:[%s4628_s0 + $0x90] sm:$0xff]  ;;  %v36_v36 = vld [vmem:[%s4628_s0 + $0x98] sm:$0xff] }
   0xa   :  { %v2761_v37 = vld [vmem:[%s4629_s2 + $0x28] sm:$0xff]   ;;  %v90_v38 = vpack.c.bf16 %v36_v36, %v35_v35  ;;  %v2762_v39 = vld [vmem:[%s4629_s2 + $0x30] sm:$0xff]   ;;  %v37_v40 = vld [vmem:[%s4628_s0 + $0xa0] sm:$0xff] }
   0xb   :  { %v38_v41 = vld [vmem:[%s4628_s0 + $0xa8] sm:$0xff]  ;;  %v2763_v42 = vld [vmem:[%s4629_s2 + $0x38] sm:$0xff]   ;;  %v39_v44 = vld [vmem:[%s4628_s0 + $0xb0] sm:$0xff] }
   0xc   :  { %2736 = vmatpush1.bf16.msra.mxu1 %v2757_v27  ;;  %770 = vmatpush1.bf16.msra.mxu0 %v2757_v27  ;;  %v91_v43 = vpack.c.bf16 %v38_v41, %v37_v40  ;;  %v40_v45 = vld [vmem:[%s4628_s0 + $0xb8] sm:$0xff]  ;;  %v2764_v46 = vld [vmem:[%s4629_s2 + $0x40] sm:$0xff]   ;;  %v2765_v48 = vld [vmem:[%s4629_s2 + $0x48] sm:$0xff]  }
   0xd   :  { %2721 = vmatprep.subr.bf16.mxu1 %v2772_v1  ;;  %771 = vmatprep.subr.bf16.mxu0 %v2772_v1  ;;  %v92_v47 = vpack.c.bf16 %v40_v45, %v39_v44  ;;  %v41_v49 = vld [vmem:[%s4628_s0 + $0xc0] sm:$0xff]  ;;  %v42_v50 = vld [vmem:[%s4628_s0 + $0xc8] sm:$0xff]  ;;  %v2766_v51 = vld [vmem:[%s4629_s2 + $0x50] sm:$0xff]  }
   0xe   :  { %2224 = vmatmul.mubr.msk.bf16.gmra.mrb[4].mxu0 %vm125_vm0, %v82_v8  ;;  %v93_v52 = vpack.c.bf16 %v42_v50, %v41_v49  ;;  %v2767_v53 = vld [vmem:[%s4629_s2 + $0x58] sm:$0xff]   ;;  %v43_v54 = vld [vmem:[%s4628_s0 + $0xd0] sm:$0xff]  ;;  %v2768_v56 = vld [vmem:[%s4629_s2 + $0x60] sm:$0xff]  }
   0xf   :  { %274 = vmatprep.mubr.bf16.mxu0 %v2772_v1  ;;  %v44_v55 = vld [vmem:[%s4628_s0 + $0xd8] sm:$0xff]  ;;  %v2769_v58 = vld [vmem:[%s4629_s2 + $0x68] sm:$0xff]   ;;  %v45_v59 = vld [vmem:[%s4628_s0 + $0xe0] sm:$0xff] }
  0x10   :  { %2737 = vmatpush1.bf16.msra.mxu1 %v2758_v29  ;;  %772 = vmatpush1.bf16.msra.mxu0 %v2758_v29  ;;  %v94_v57 = vpack.c.bf16 %v44_v55, %v43_v54  ;;  %v46_v60 = vld [vmem:[%s4628_s0 + $0xe8] sm:$0xff]  ;;  %v2770_v61 = vld [vmem:[%s4629_s2 + $0x70] sm:$0xff]   ;;  %v2771_v63 = vld [vmem:[%s4629_s2 + $0x78] sm:$0xff]  }
  0x11   :  { %2722 = vmatprep.subr.bf16.mxu1 %v2772_v1  ;;  %773 = vmatprep.subr.bf16.mxu0 %v2772_v1  ;;  %v95_v62 = vpack.c.bf16 %v46_v60, %v45_v59  ;;  %v47_v0 = vld [vmem:[%s4628_s0 + $0xf0] sm:$0xff]  ;;  %v48_v2 = vld [vmem:[%s4628_s0 + $0xf8] sm:$0xff]  ;;  %v49_v4 = vld [vmem:[%s4628_s0 + $0x100] sm:$0xff] }
  0x12   :  { %v96_v3 = vpack.c.bf16 %v48_v2, %v47_v0  ;;  %v50_v5 = vld [vmem:[%s4628_s0 + $0x108] sm:$0xff]  ;;  %v51_v7 = vld [vmem:[%s4628_s0 + $0x110] sm:$0xff]  ;;  %v52_v8 = vld [vmem:[%s4628_s0 + $0x118] sm:$0xff] }
  0x13   :  { %v97_v6 = vpack.c.bf16 %v50_v5, %v49_v4  ;;  %v98_v9 = vpack.c.bf16 %v52_v8, %v51_v7  ;;  %v53_v10 = vld [vmem:[%s4628_s0 + $0x120] sm:$0xff]  ;;  %v55_v13 = vld [vmem:[%s4628_s0 + $0x130] sm:$0xff]  ;;  %v64_v26 = vld [vmem:[%s4628_s0 + $0x178] sm:$0xff] }
  0x14   :  { %2738 = vmatpush1.bf16.msra.mxu1 %v2759_v32  ;;  %774 = vmatpush1.bf16.msra.mxu0 %v2759_v32  ;;  %v57_v16 = vld [vmem:[%s4628_s0 + $0x140] sm:$0xff]  ;;  %v59_v19 = vld [vmem:[%s4628_s0 + $0x150] sm:$0xff]  ;;  %v66_v29 = vld [vmem:[%s4628_s0 + $0x188] sm:$0xff] }
  0x15   :  { %2723 = vmatprep.subr.bf16.mxu1 %v2772_v1  ;;  %775 = vmatprep.subr.bf16.mxu0 %v2772_v1  ;;  %v61_v22 = vld [vmem:[%s4628_s0 + $0x160] sm:$0xff]  ;;  %v63_v25 = vld [vmem:[%s4628_s0 + $0x170] sm:$0xff]  ;;  %v68_v32 = vld [vmem:[%s4628_s0 + $0x198] sm:$0xff] }
  0x16   :  { %2225 = vmatmul.mubr.msk.bf16.gmra.mrb[8].mxu0 %vm125_vm0, %v83_v11  ;;  %v54_v11 = vld [vmem:[%s4628_s0 + $0x128] sm:$0xff]  ;;  %v104_v27 = vpack.c.bf16 %v64_v26, %v63_v25  ;;  %v67_v31 = vld [vmem:[%s4628_s0 + $0x190] sm:$0xff]  ;;  %v73_v50 = vld [vmem:[%s4628_s0 + $0x1c0] sm:$0xff] }
  0x17   :  { %284 = vmatprep.mubr.bf16.mxu0 %v2772_v1  ;;  %v99_v12 = vpack.c.bf16 %v54_v11, %v53_v10  ;;  %v70_v35 = vld [vmem:[%s4628_s0 + $0x1a8] sm:$0xff]  ;;  %v76_v0 = vld [vmem:[%s4628_s0 + $0x1d8] sm:$0xff]  ;;  %v79_v26 = vld [vmem:[%s4628_s0 + $0x1f0] sm:$0xff] }
  0x18   :  { %2739 = vmatpush1.bf16.msra.mxu1 %v2760_v34  ;;  %776 = vmatpush1.bf16.msra.mxu0 %v2760_v34  ;;  %v69_v34 = vld [vmem:[%s4628_s0 + $0x1a0] sm:$0xff] }
  0x19   :  { %2724 = vmatprep.subr.bf16.mxu1 %v2772_v1  ;;  %777 = vmatprep.subr.bf16.mxu0 %v2772_v1  ;;  %v107_v36 = vpack.c.bf16 %v70_v35, %v69_v34 }
  0x1c   :  { %2740 = vmatpush1.bf16.msra.mxu1 %v2761_v37  ;;  %778 = vmatpush1.bf16.msra.mxu0 %v2761_v37  ;;  %v71_v37 = vld [vmem:[%s4628_s0 + $0x1b0] sm:$0xff] }
  0x1d   :  { %2725 = vmatprep.subr.bf16.mxu1 %v2772_v1  ;;  %779 = vmatprep.subr.bf16.mxu0 %v2772_v1 }
  0x1e   :  { %2226 = vmatmul.mubr.msk.bf16.gmra.mrb[12].mxu0 %vm125_vm0, %v84_v14  ;;  %v56_v14 = vld [vmem:[%s4628_s0 + $0x138] sm:$0xff] }
  0x1f   :  { %294 = vmatprep.mubr.bf16.mxu0 %v2772_v1  ;;  %v100_v15 = vpack.c.bf16 %v56_v14, %v55_v13  ;;  %v77_v13 = vld [vmem:[%s4628_s0 + $0x1e0] sm:$0xff]  ;;  %v78_v14 = vld [vmem:[%s4628_s0 + $0x1e8] sm:$0xff] }
  0x20   :  { %2741 = vmatpush1.bf16.msra.mxu1 %v2762_v39  ;;  %780 = vmatpush1.bf16.msra.mxu0 %v2762_v39 }
  0x21   :  { %2726 = vmatprep.subr.bf16.mxu1 %v2772_v1  ;;  %781 = vmatprep.subr.bf16.mxu0 %v2772_v1 }
  0x24   :  { %2742 = vmatpush1.bf16.msra.mxu1 %v2763_v42  ;;  %782 = vmatpush1.bf16.msra.mxu0 %v2763_v42 }
  0x25   :  { %2727 = vmatprep.subr.bf16.mxu1 %v2772_v1  ;;  %783 = vmatprep.subr.bf16.mxu0 %v2772_v1 }
  0x26   :  { %2227 = vmatmul.mubr.msk.bf16.gmra.mrb[16].mxu0 %vm125_vm0, %v85_v17  ;;  %v58_v17 = vld [vmem:[%s4628_s0 + $0x148] sm:$0xff] }
  0x27   :  { %304 = vmatprep.mubr.bf16.mxu0 %v2772_v1  ;;  %v101_v18 = vpack.c.bf16 %v58_v17, %v57_v16 }
  0x28   :  { %2743 = vmatpush1.bf16.msra.mxu1 %v2764_v46  ;;  %784 = vmatpush1.bf16.msra.mxu0 %v2764_v46 }
  0x29   :  { %2728 = vmatprep.subr.bf16.mxu1 %v2772_v1  ;;  %785 = vmatprep.subr.bf16.mxu0 %v2772_v1 }
  0x2c   :  { %2744 = vmatpush1.bf16.msra.mxu1 %v2765_v48  ;;  %786 = vmatpush1.bf16.msra.mxu0 %v2765_v48 }
  0x2d   :  { %2729 = vmatprep.subr.bf16.mxu1 %v2772_v1  ;;  %787 = vmatprep.subr.bf16.mxu0 %v2772_v1 }
  0x2e   :  { %2228 = vmatmul.mubr.msk.bf16.gmra.mrb[20].mxu0 %vm125_vm0, %v86_v20  ;;  %v60_v20 = vld [vmem:[%s4628_s0 + $0x158] sm:$0xff] }
  0x2f   :  { %314 = vmatprep.mubr.bf16.mxu0 %v2772_v1  ;;  %v102_v21 = vpack.c.bf16 %v60_v20, %v59_v19 }
  0x30   :  { %2745 = vmatpush1.bf16.msra.mxu1 %v2766_v51  ;;  %788 = vmatpush1.bf16.msra.mxu0 %v2766_v51  ;;  %v74_v51 = vld [vmem:[%s4628_s0 + $0x1c8] sm:$0xff] }
  0x31   :  { %2730 = vmatprep.subr.bf16.mxu1 %v2772_v1  ;;  %789 = vmatprep.subr.bf16.mxu0 %v2772_v1  ;;  %v109_v55 = vpack.c.bf16 %v74_v51, %v73_v50 }
  0x34   :  { %2746 = vmatpush1.bf16.msra.mxu1 %v2767_v53  ;;  %790 = vmatpush1.bf16.msra.mxu0 %v2767_v53 }
  0x35   :  { %2731 = vmatprep.subr.bf16.mxu1 %v2772_v1  ;;  %791 = vmatprep.subr.bf16.mxu0 %v2772_v1 }
  0x36   :  { %2229 = vmatmul.mubr.msk.bf16.gmra.mrb[24].mxu0 %vm125_vm0, %v87_v23  ;;  %v62_v23 = vld [vmem:[%s4628_s0 + $0x168] sm:$0xff] }
  0x37   :  { %324 = vmatprep.mubr.bf16.mxu0 %v2772_v1  ;;  %v103_v24 = vpack.c.bf16 %v62_v23, %v61_v22 }
  0x38   :  { %2747 = vmatpush1.bf16.msra.mxu1 %v2768_v56  ;;  %792 = vmatpush1.bf16.msra.mxu0 %v2768_v56 }
  0x39   :  { %2732 = vmatprep.subr.bf16.mxu1 %v2772_v1  ;;  %793 = vmatprep.subr.bf16.mxu0 %v2772_v1 }
  0x3c   :  { %2748 = vmatpush1.bf16.msra.mxu1 %v2769_v58  ;;  %794 = vmatpush1.bf16.msra.mxu0 %v2769_v58 }
  0x3d   :  { %2733 = vmatprep.subr.bf16.mxu1 %v2772_v1  ;;  %795 = vmatprep.subr.bf16.mxu0 %v2772_v1 }
  0x3e   :  { %2230 = vmatmul.mubr.msk.bf16.gmra.mrb[28].mxu0 %vm125_vm0, %v88_v28  ;;  %v65_v28 = vld [vmem:[%s4628_s0 + $0x180] sm:$0xff] }
  0x3f   :  { %334 = vmatprep.mubr.bf16.mxu0 %v2772_v1  ;;  %v105_v30 = vpack.c.bf16 %v66_v29, %v65_v28 }
  0x40   :  { %2749 = vmatpush1.bf16.msra.mxu1 %v2770_v61  ;;  %796 = vmatpush1.bf16.msra.mxu0 %v2770_v61 }
  0x41   :  { %2734 = vmatprep.subr.bf16.mxu1 %v2772_v1  ;;  %797 = vmatprep.subr.bf16.mxu0 %v2772_v1 }
  0x44   :  { %2750 = vmatpush1.bf16.msra.mxu1 %v2771_v63  ;;  %798 = vmatpush1.bf16.msra.mxu0 %v2771_v63  ;;  %v75_v63 = vld [vmem:[%s4628_s0 + $0x1d0] sm:$0xff] }
  0x45   :  { %v110_v5 = vpack.c.bf16 %v76_v0, %v75_v63 }
  0x46   :  { %2231 = vmatmul.mubr.msk.bf16.gmra.mrb[32].mxu0 %vm125_vm0, %v89_v33  ;;  %v106_v33 = vpack.c.bf16 %v68_v32, %v67_v31 }
  0x47   :  { %344 = vmatprep.mubr.bf16.mxu0 %v2772_v1 }
  0x4e   :  { %2232 = vmatmul.mubr.msk.bf16.gmra.mrb[36].mxu0 %vm125_vm0, %v90_v38  ;;  %v72_v38 = vld [vmem:[%s4628_s0 + $0x1b8] sm:$0xff] }
  0x4f   :  { %354 = vmatprep.mubr.bf16.mxu0 %v2772_v1  ;;  %v108_v42 = vpack.c.bf16 %v72_v38, %v71_v37 }
  0x56   :  { %2233 = vmatmul.mubr.msk.bf16.gmra.mrb[40].mxu0 %vm125_vm0, %v91_v43 }
  0x57   :  { %364 = vmatprep.mubr.bf16.mxu0 %v2772_v1 }
  0x5e   :  { %2234 = vmatmul.mubr.msk.bf16.gmra.mrb[44].mxu0 %vm125_vm0, %v92_v47 }
  0x5f   :  { %374 = vmatprep.mubr.bf16.mxu0 %v2772_v1 }
  0x66   :  { %2235 = vmatmul.mubr.msk.bf16.gmra.mrb[48].mxu0 %vm125_vm0, %v93_v52 }
  0x67   :  { %384 = vmatprep.mubr.bf16.mxu0 %v2772_v1 }
  0x6e   :  { %2236 = vmatmul.mubr.msk.bf16.gmra.mrb[52].mxu0 %vm125_vm0, %v94_v57 }
  0x6f   :  { %394 = vmatprep.mubr.bf16.mxu0 %v2772_v1 }
  0x76   :  { %2237 = vmatmul.mubr.msk.bf16.gmra.mrb[56].mxu0 %vm125_vm0, %v95_v62 }
  0x77   :  { %404 = vmatprep.mubr.bf16.mxu0 %v2772_v1 }
  0x7e   :  { %2238 = vmatmul.mubr.msk.bf16.gmra.mrb[60].mxu0 %vm125_vm0, %v96_v3 }
  0x7f   :  { %414 = vmatprep.mubr.bf16.mxu0 %v2772_v1 }
  0x86   :  { %2239 = vmatmul.mubr.msk.bf16.gmra.mrb[64].mxu0 %vm125_vm0, %v97_v6 }
  0x87   :  { %424 = vmatprep.mubr.bf16.mxu0 %v2772_v1 }
  0x8e   :  { %2240 = vmatmul.mubr.msk.bf16.gmra.mrb[68].mxu0 %vm125_vm0, %v98_v9 }
  0x8f   :  { %434 = vmatprep.mubr.bf16.mxu0 %v2772_v1 }
  0x96   :  { %2241 = vmatmul.mubr.msk.bf16.gmra.mrb[72].mxu0 %vm125_vm0, %v99_v12 }
  0x97   :  { %444 = vmatprep.mubr.bf16.mxu0 %v2772_v1 }
  0x9e   :  { %2242 = vmatmul.mubr.msk.bf16.gmra.mrb[76].mxu0 %vm125_vm0, %v100_v15 }
  0x9f   :  { %454 = vmatprep.mubr.bf16.mxu0 %v2772_v1 }
  0xa6   :  { %2243 = vmatmul.mubr.msk.bf16.gmra.mrb[80].mxu0 %vm125_vm0, %v101_v18  ;;  %v111_v18 = vpack.c.bf16 %v78_v14, %v77_v13 }
  0xa7   :  { %464 = vmatprep.mubr.bf16.mxu0 %v2772_v1 }
  0xae   :  { %2244 = vmatmul.mubr.msk.bf16.gmra.mrb[84].mxu0 %vm125_vm0, %v102_v21 }
  0xaf   :  { %474 = vmatprep.mubr.bf16.mxu0 %v2772_v1 }
  0xb6   :  { %2245 = vmatmul.mubr.msk.bf16.gmra.mrb[88].mxu0 %vm125_vm0, %v103_v24 }
  0xb7   :  { %484 = vmatprep.mubr.bf16.mxu0 %v2772_v1 }
  0xbe   :  { %2246 = vmatmul.mubr.msk.bf16.gmra.mrb[92].mxu0 %vm125_vm0, %v104_v27  ;;  %v80_v27 = vld [vmem:[%s4628_s0 + $0x1f8] sm:$0xff] }
  0xbf   :  { %494 = vmatprep.mubr.bf16.mxu0 %v2772_v1  ;;  %v112_v31 = vpack.c.bf16 %v80_v27, %v79_v26 }
  0xc6   :  { %2247 = vmatmul.mubr.msk.bf16.gmra.mrb[96].mxu0 %vm125_vm0, %v105_v30 }
  0xc7   :  { %504 = vmatprep.mubr.bf16.mxu0 %v2772_v1 }
  0xce   :  { %2248 = vmatmul.mubr.msk.bf16.gmra.mrb[100].mxu0 %vm125_vm0, %v106_v33 }
  0xcf   :  { %514 = vmatprep.mubr.bf16.mxu0 %v2772_v1 }
  0xd6   :  { %2249 = vmatmul.mubr.msk.bf16.gmra.mrb[104].mxu0 %vm125_vm0, %v107_v36 }
  0xd7   :  { %524 = vmatprep.mubr.bf16.mxu0 %v2772_v1 }
  0xd9   :  { %v3108_v39 = vpop.f32.mrb[0].mxu0 }
  0xda   :  { %v3110_v40 = vpop.f32.mrb[1].mxu0  ;;  %v2591_v41 = vpack.c.bf16 %v3108_v39, %v3108_v39 }
  0xdb   :  { %v2655_v43 = vpack.c.bf16 %v3110_v40, %v3110_v40  ;;  %v3116_v44 = vpop.f32.mrb[2].mxu0 }
  0xdc   :  { %v575_v45 = vpack.c.bf16 %v3116_v44, %v3108_v39  ;;  %v2592_v46 = vpack.c.bf16 %v3116_v44, %v3116_v44  ;;  %1410 = vrot.lane.b32.xlu0 %v2591_v41, %s2773_s25  ;;  %1346 = vst.msk [vmem:[%s4630_s3] sm:$0xf] %vm1345_vm1, %v2591_v41  ;;  %v3127_v47 = vpop.f32.mrb[3].mxu0 }
  0xdd   :  { %2463 = vst.msk [vmem:[%s4630_s3 + $0x200] sm:$0xf] %vm1345_vm1, %v2655_v43  ;;  %v576_v48 = vpack.c.bf16 %v3127_v47, %v3110_v40  ;;  %v2656_v49 = vpack.c.bf16 %v3127_v47, %v3127_v47 }
  0xde   :  { %1347 = vst.msk [vmem:[%s4630_s3 + $0x4] sm:$0xf] %vm1345_vm1, %v2592_v46  ;;  %2250 = vmatmul.mubr.msk.bf16.gmra.mrb[108].mxu0 %vm125_vm0, %v108_v42 }
  0xdf   :  { %1958 = vrot.lane.b32.xlu1 %v2656_v49, %s2773_s25  ;;  %2464 = vst.msk [vmem:[%s4630_s3 + $0x204] sm:$0xf] %vm1345_vm1, %v2656_v49  ;;  %534 = vmatprep.mubr.bf16.mxu0 %v2772_v1 }
  0xe0   :  { %1956 = vrot.lane.b32.xlu0 %v2655_v43, %s2773_s25 }
  0xe1   :  { %v3155_v52 = vpop.f32.mrb[4].mxu0 }
  0xe2   :  { %v2593_v53 = vpack.c.bf16 %v3155_v52, %v3155_v52  ;;  %v3159_v54 = vpop.f32.mrb[5].mxu0 }
  0xe3   :  { %v2657_v56 = vpack.c.bf16 %v3159_v54, %v3159_v54  ;;  %v3163_v57 = vpop.f32.mrb[6].mxu0 }
  0xe4   :  { %1348 = vst.msk [vmem:[%s4630_s3 + $0x8] sm:$0xf] %vm1345_vm1, %v2593_v53  ;;  %v577_v58 = vpack.c.bf16 %v3163_v57, %v3155_v52  ;;  %v2594_v59 = vpack.c.bf16 %v3163_v57, %v3163_v57  ;;  %1412 = vrot.lane.b32.xlu0 %v2592_v46, %s2773_s25  ;;  %1414 = vrot.lane.b32.xlu1 %v2593_v53, %s2773_s25  ;;  %v3175_v60 = vpop.f32.mrb[7].mxu0 }
  0xe5   :  { %2465 = vst.msk [vmem:[%s4630_s3 + $0x208] sm:$0xf] %vm1345_vm1, %v2657_v56  ;;  %v578_v61 = vpack.c.bf16 %v3175_v60, %v3159_v54  ;;  %v2658_v62 = vpack.c.bf16 %v3175_v60, %v3175_v60 }
  0xe6   :  { %1349 = vst.msk [vmem:[%s4630_s3 + $0xc] sm:$0xf] %vm1345_vm1, %v2594_v59  ;;  %2251 = vmatmul.mubr.msk.bf16.gmra.mrb[112].mxu0 %vm125_vm0, %v109_v55 }
  0xe7   :  { %2466 = vst.msk [vmem:[%s4630_s3 + $0x20c] sm:$0xf] %vm1345_vm1, %v2658_v62  ;;  %544 = vmatprep.mubr.bf16.mxu0 %v2772_v1 }
  0xe8   :  { %1960 = vrot.lane.b32.xlu0 %v2657_v56, %s2773_s25  ;;  %1416 = vrot.lane.b32.xlu1 %v2594_v59, %s2773_s25 }
  0xe9   :  { %v3203_v2 = vpop.f32.mrb[8].mxu0 }
  0xea   :  { %v2595_v3 = vpack.c.bf16 %v3203_v2, %v3203_v2  ;;  %v3207_v4 = vpop.f32.mrb[9].mxu0 }
  0xeb   :  { %v2659_v6 = vpack.c.bf16 %v3207_v4, %v3207_v4  ;;  %v3211_v7 = vpop.f32.mrb[10].mxu0 }
  0xec   :  { %1350 = vst.msk [vmem:[%s4630_s3 + $0x10] sm:$0xf] %vm1345_vm1, %v2595_v3  ;;  %v579_v8 = vpack.c.bf16 %v3211_v7, %v3203_v2  ;;  %v2596_v9 = vpack.c.bf16 %v3211_v7, %v3211_v7  ;;  %1962 = vrot.lane.b32.xlu1 %v2658_v62, %s2773_s25  ;;  %1418 = vrot.lane.b32.xlu0 %v2595_v3, %s2773_s25  ;;  %v3223_v10 = vpop.f32.mrb[11].mxu0 }
  0xed   :  { %2467 = vst.msk [vmem:[%s4630_s3 + $0x210] sm:$0xf] %vm1345_vm1, %v2659_v6  ;;  %v580_v11 = vpack.c.bf16 %v3223_v10, %v3207_v4  ;;  %v2660_v12 = vpack.c.bf16 %v3223_v10, %v3223_v10 }
  0xee   :  { %1351 = vst.msk [vmem:[%s4630_s3 + $0x14] sm:$0xf] %vm1345_vm1, %v2596_v9  ;;  %2252 = vmatmul.mubr.msk.bf16.gmra.mrb[116].mxu0 %vm125_vm0, %v110_v5 }
  0xef   :  { %2468 = vst.msk [vmem:[%s4630_s3 + $0x214] sm:$0xf] %vm1345_vm1, %v2660_v12  ;;  %554 = vmatprep.mubr.bf16.mxu0 %v2772_v1 }
  0xf0   :  { %1964 = vrot.lane.b32.xlu0 %v2659_v6, %s2773_s25  ;;  %1420 = vrot.lane.b32.xlu1 %v2596_v9, %s2773_s25 }
  0xf1   :  { %v286_v15 = vpop.f32.mrb[12].mxu0 }
  0xf2   :  { %v2597_v16 = vpack.c.bf16 %v286_v15, %v286_v15  ;;  %v288_v17 = vpop.f32.mrb[13].mxu0 }
  0xf3   :  { %v2661_v19 = vpack.c.bf16 %v288_v17, %v288_v17  ;;  %v290_v20 = vpop.f32.mrb[14].mxu0 }
  0xf4   :  { %1352 = vst.msk [vmem:[%s4630_s3 + $0x18] sm:$0xf] %vm1345_vm1, %v2597_v16  ;;  %v581_v21 = vpack.c.bf16 %v290_v20, %v286_v15  ;;  %v2598_v22 = vpack.c.bf16 %v290_v20, %v290_v20  ;;  %1966 = vrot.lane.b32.xlu1 %v2660_v12, %s2773_s25  ;;  %1422 = vrot.lane.b32.xlu0 %v2597_v16, %s2773_s25  ;;  %v292_v23 = vpop.f32.mrb[15].mxu0 }
  0xf5   :  { %2469 = vst.msk [vmem:[%s4630_s3 + $0x218] sm:$0xf] %vm1345_vm1, %v2661_v19  ;;  %v2662_v24 = vpack.c.bf16 %v292_v23, %v292_v23  ;;  %v582_v25 = vpack.c.bf16 %v292_v23, %v288_v17 }
  0xf6   :  { %1353 = vst.msk [vmem:[%s4630_s3 + $0x1c] sm:$0xf] %vm1345_vm1, %v2598_v22  ;;  %2253 = vmatmul.mubr.msk.bf16.gmra.mrb[120].mxu0 %vm125_vm0, %v111_v18 }
  0xf7   :  { %2470 = vst.msk [vmem:[%s4630_s3 + $0x21c] sm:$0xf] %vm1345_vm1, %v2662_v24  ;;  %823 = vmatprep.mubr.bf16.mxu1 %v582_v25  ;;  %564 = vmatprep.mubr.bf16.mxu0 %v2772_v1 }
  0xf8   :  { %1968 = vrot.lane.b32.xlu0 %v2661_v19, %s2773_s25  ;;  %1424 = vrot.lane.b32.xlu1 %v2598_v22, %s2773_s25 }
  0xf9   :  { %824 = vmatmul.mubr.bf16.vlgmr.msra.gmra.mrb[0].mxu1 %v581_v21  ;;  %v296_v28 = vpop.f32.mrb[16].mxu0 }
  0xfa   :  { %v2599_v29 = vpack.c.bf16 %v296_v28, %v296_v28  ;;  %v298_v30 = vpop.f32.mrb[17].mxu0 }
  0xfb   :  { %v2663_v32 = vpack.c.bf16 %v298_v30, %v298_v30  ;;  %v300_v33 = vpop.f32.mrb[18].mxu0 }
  0xfc   :  { %1354 = vst.msk [vmem:[%s4630_s3 + $0x20] sm:$0xf] %vm1345_vm1, %v2599_v29  ;;  %v583_v1 = vpack.c.bf16 %v300_v33, %v296_v28  ;;  %v2600_v34 = vpack.c.bf16 %v300_v33, %v300_v33  ;;  %1970 = vrot.lane.b32.xlu1 %v2662_v24, %s2773_s25  ;;  %1426 = vrot.lane.b32.xlu0 %v2599_v29, %s2773_s25  ;;  %v302_v35 = vpop.f32.mrb[19].mxu0 }
  0xfd   :  { %2471 = vst.msk [vmem:[%s4630_s3 + $0x220] sm:$0xf] %vm1345_vm1, %v2663_v32  ;;  %v584_v36 = vpack.c.bf16 %v302_v35, %v298_v30  ;;  %v2664_v37 = vpack.c.bf16 %v302_v35, %v302_v35 }
  0xfe   :  { %1355 = vst.msk [vmem:[%s4630_s3 + $0x24] sm:$0xf] %vm1345_vm1, %v2600_v34  ;;  %2254 = vmatmul.mubr.msk.bf16.gmra.mrb[124].mxu0 %vm125_vm0, %v112_v31 }
  0xff   :  { %2472 = vst.msk [vmem:[%s4630_s3 + $0x224] sm:$0xf] %vm1345_vm1, %v2664_v37  ;;  %799 = vmatprep.mubr.bf16.mxu0 %v576_v48  ;;  %831 = vmatprep.mubr.bf16.mxu1 %v584_v36 }
 0x100   :  { %1972 = vrot.lane.b32.xlu0 %v2663_v32, %s2773_s25  ;;  %1428 = vrot.lane.b32.xlu1 %v2600_v34, %s2773_s25 }
 0x101   :  { %832 = vmatmul.mubr.bf16.gmra.mrb[4].mxu1 %v583_v1  ;;  %v306_v38 = vpop.f32.mrb[20].mxu0 }
 0x102   :  { %v2601_v41 = vpack.c.bf16 %v306_v38, %v306_v38  ;;  %v308_v42 = vpop.f32.mrb[21].mxu0 }
 0x103   :  { %v2665_v43 = vpack.c.bf16 %v308_v42, %v308_v42  ;;  %v310_v46 = vpop.f32.mrb[22].mxu0 }
 0x104   :  { %1356 = vst.msk [vmem:[%s4630_s3 + $0x28] sm:$0xf] %vm1345_vm1, %v2601_v41  ;;  %v585_v49 = vpack.c.bf16 %v310_v46, %v306_v38  ;;  %v2602_v50 = vpack.c.bf16 %v310_v46, %v310_v46  ;;  %1974 = vrot.lane.b32.xlu1 %v2664_v37, %s2773_s25  ;;  %1430 = vrot.lane.b32.xlu0 %v2601_v41, %s2773_s25  ;;  %v312_v40 = vpop.f32.mrb[23].mxu0 }
 0x105   :  { %2473 = vst.msk [vmem:[%s4630_s3 + $0x228] sm:$0xf] %vm1345_vm1, %v2665_v43  ;;  %v586_v47 = vpack.c.bf16 %v312_v40, %v308_v42  ;;  %v2666_v48 = vpack.c.bf16 %v312_v40, %v312_v40 }
 0x106   :  { %1357 = vst.msk [vmem:[%s4630_s3 + $0x2c] sm:$0xf] %vm1345_vm1, %v2602_v50  ;;  %800 = vmatmul.mubr.bf16.vlgmr.msra.gmra.mrb[128].mxu0 %v575_v45 }
 0x107   :  { %2474 = vst.msk [vmem:[%s4630_s3 + $0x22c] sm:$0xf] %vm1345_vm1, %v2666_v48  ;;  %807 = vmatprep.mubr.bf16.mxu0 %v578_v61  ;;  %839 = vmatprep.mubr.bf16.mxu1 %v586_v47 }
 0x108   :  { %1976 = vrot.lane.b32.xlu0 %v2665_v43, %s2773_s25  ;;  %1432 = vrot.lane.b32.xlu1 %v2602_v50, %s2773_s25 }
 0x109   :  { %840 = vmatmul.mubr.bf16.gmra.mrb[8].mxu1 %v585_v49  ;;  %v316_v51 = vpop.f32.mrb[24].mxu0 }
 0x10a   :  { %v2603_v53 = vpack.c.bf16 %v316_v51, %v316_v51  ;;  %v318_v55 = vpop.f32.mrb[25].mxu0 }
 0x10b   :  { %v2667_v39 = vpack.c.bf16 %v318_v55, %v318_v55  ;;  %v320_v44 = vpop.f32.mrb[26].mxu0 }
 0x10c   :  { %1358 = vst.msk [vmem:[%s4630_s3 + $0x30] sm:$0xf] %vm1345_vm1, %v2603_v53  ;;  %v587_v45 = vpack.c.bf16 %v320_v44, %v316_v51  ;;  %v2604_v56 = vpack.c.bf16 %v320_v44, %v320_v44  ;;  %1978 = vrot.lane.b32.xlu1 %v2666_v48, %s2773_s25  ;;  %1434 = vrot.lane.b32.xlu0 %v2603_v53, %s2773_s25  ;;  %v322_v54 = vpop.f32.mrb[27].mxu0 }
 0x10d   :  { %2475 = vst.msk [vmem:[%s4630_s3 + $0x230] sm:$0xf] %vm1345_vm1, %v2667_v39  ;;  %v588_v59 = vpack.c.bf16 %v322_v54, %v318_v55  ;;  %v2668_v60 = vpack.c.bf16 %v322_v54, %v322_v54 }
 0x10e   :  { %1359 = vst.msk [vmem:[%s4630_s3 + $0x34] sm:$0xf] %vm1345_vm1, %v2604_v56  ;;  %808 = vmatmul.mubr.bf16.gmra.mrb[132].mxu0 %v577_v58 }
 0x10f   :  { %2476 = vst.msk [vmem:[%s4630_s3 + $0x234] sm:$0xf] %vm1345_vm1, %v2668_v60  ;;  %815 = vmatprep.mubr.bf16.mxu0 %v580_v11  ;;  %847 = vmatprep.mubr.bf16.mxu1 %v588_v59 }
 0x110   :  { %1980 = vrot.lane.b32.xlu0 %v2667_v39, %s2773_s25  ;;  %1436 = vrot.lane.b32.xlu1 %v2604_v56, %s2773_s25 }
 0x111   :  { %848 = vmatmul.mubr.bf16.gmra.mrb[12].mxu1 %v587_v45  ;;  %v326_v61 = vpop.f32.mrb[28].mxu0 }
 0x112   :  { %v2605_v62 = vpack.c.bf16 %v326_v61, %v326_v61  ;;  %v328_v63 = vpop.f32.mrb[29].mxu0 }
 0x113   :  { %v2669_v52 = vpack.c.bf16 %v328_v63, %v328_v63  ;;  %v330_v57 = vpop.f32.mrb[30].mxu0 }
 0x114   :  { %1360 = vst.msk [vmem:[%s4630_s3 + $0x38] sm:$0xf] %vm1345_vm1, %v2605_v62  ;;  %v589_v58 = vpack.c.bf16 %v330_v57, %v326_v61  ;;  %v2606_v0 = vpack.c.bf16 %v330_v57, %v330_v57  ;;  %1982 = vrot.lane.b32.xlu1 %v2668_v60, %s2773_s25  ;;  %1438 = vrot.lane.b32.xlu0 %v2605_v62, %s2773_s25  ;;  %v332_v3 = vpop.f32.mrb[31].mxu0 }
 0x115   :  { %2477 = vst.msk [vmem:[%s4630_s3 + $0x238] sm:$0xf] %vm1345_vm1, %v2669_v52  ;;  %v590_v4 = vpack.c.bf16 %v332_v3, %v328_v63  ;;  %v2670_v5 = vpack.c.bf16 %v332_v3, %v332_v3 }
 0x116   :  { %1361 = vst.msk [vmem:[%s4630_s3 + $0x3c] sm:$0xf] %vm1345_vm1, %v2606_v0  ;;  %816 = vmatmul.mubr.bf16.gmra.mrb[136].mxu0 %v579_v8 }
 0x117   :  { %2478 = vst.msk [vmem:[%s4630_s3 + $0x23c] sm:$0xf] %vm1345_vm1, %v2670_v5  ;;  %855 = vmatprep.mubr.bf16.mxu1 %v590_v4 }
 0x118   :  { %1984 = vrot.lane.b32.xlu0 %v2669_v52, %s2773_s25  ;;  %1440 = vrot.lane.b32.xlu1 %v2606_v0, %s2773_s25 }
 0x119   :  { %856 = vmatmul.mubr.bf16.gmra.mrb[16].mxu1 %v589_v58  ;;  %v336_v6 = vpop.f32.mrb[32].mxu0 }
 0x11a   :  { %v2607_v9 = vpack.c.bf16 %v336_v6, %v336_v6  ;;  %v338_v10 = vpop.f32.mrb[33].mxu0 }
 0x11b   :  { %v2671_v11 = vpack.c.bf16 %v338_v10, %v338_v10  ;;  %v340_v12 = vpop.f32.mrb[34].mxu0 }
 0x11c   :  { %1362 = vst.msk [vmem:[%s4630_s3 + $0x40] sm:$0xf] %vm1345_vm1, %v2607_v9  ;;  %v591_v2 = vpack.c.bf16 %v340_v12, %v336_v6  ;;  %v2608_v7 = vpack.c.bf16 %v340_v12, %v340_v12  ;;  %1986 = vrot.lane.b32.xlu1 %v2670_v5, %s2773_s25  ;;  %1442 = vrot.lane.b32.xlu0 %v2607_v9, %s2773_s25  ;;  %v342_v8 = vpop.f32.mrb[35].mxu0 }
 0x11d   :  { %2479 = vst.msk [vmem:[%s4630_s3 + $0x240] sm:$0xf] %vm1345_vm1, %v2671_v11  ;;  %v592_v13 = vpack.c.bf16 %v342_v8, %v338_v10  ;;  %v2672_v14 = vpack.c.bf16 %v342_v8, %v342_v8 }
 0x11e   :  { %1363 = vst.msk [vmem:[%s4630_s3 + $0x44] sm:$0xf] %vm1345_vm1, %v2608_v7 }
 0x11f   :  { %2480 = vst.msk [vmem:[%s4630_s3 + $0x244] sm:$0xf] %vm1345_vm1, %v2672_v14  ;;  %863 = vmatprep.mubr.bf16.mxu1 %v592_v13 }
 0x120   :  { %1988 = vrot.lane.b32.xlu0 %v2671_v11, %s2773_s25  ;;  %1444 = vrot.lane.b32.xlu1 %v2608_v7, %s2773_s25 }
 0x121   :  { %864 = vmatmul.mubr.bf16.gmra.mrb[20].mxu1 %v591_v2  ;;  %v346_v15 = vpop.f32.mrb[36].mxu0 }
 0x122   :  { %v2609_v16 = vpack.c.bf16 %v346_v15, %v346_v15  ;;  %v348_v17 = vpop.f32.mrb[37].mxu0 }
 0x123   :  { %v2673_v18 = vpack.c.bf16 %v348_v17, %v348_v17  ;;  %v350_v19 = vpop.f32.mrb[38].mxu0 }
 0x124   :  { %1364 = vst.msk [vmem:[%s4630_s3 + $0x48] sm:$0xf] %vm1345_vm1, %v2609_v16  ;;  %v593_v20 = vpack.c.bf16 %v350_v19, %v346_v15  ;;  %v2610_v21 = vpack.c.bf16 %v350_v19, %v350_v19  ;;  %1990 = vrot.lane.b32.xlu1 %v2672_v14, %s2773_s25  ;;  %1446 = vrot.lane.b32.xlu0 %v2609_v16, %s2773_s25  ;;  %v352_v22 = vpop.f32.mrb[39].mxu0 }
 0x125   :  { %2481 = vst.msk [vmem:[%s4630_s3 + $0x248] sm:$0xf] %vm1345_vm1, %v2673_v18  ;;  %v594_v23 = vpack.c.bf16 %v352_v22, %v348_v17  ;;  %v2674_v24 = vpack.c.bf16 %v352_v22, %v352_v22 }
 0x126   :  { %1365 = vst.msk [vmem:[%s4630_s3 + $0x4c] sm:$0xf] %vm1345_vm1, %v2610_v21 }
 0x127   :  { %2482 = vst.msk [vmem:[%s4630_s3 + $0x24c] sm:$0xf] %vm1345_vm1, %v2674_v24  ;;  %871 = vmatprep.mubr.bf16.mxu1 %v594_v23 }
 0x128   :  { %1992 = vrot.lane.b32.xlu0 %v2673_v18, %s2773_s25  ;;  %1448 = vrot.lane.b32.xlu1 %v2610_v21, %s2773_s25 }
 0x129   :  { %872 = vmatmul.mubr.bf16.gmra.mrb[24].mxu1 %v593_v20  ;;  %v356_v25 = vpop.f32.mrb[40].mxu0 }
 0x12a   :  { %v2611_v26 = vpack.c.bf16 %v356_v25, %v356_v25  ;;  %v358_v27 = vpop.f32.mrb[41].mxu0 }
 0x12b   :  { %v2675_v28 = vpack.c.bf16 %v358_v27, %v358_v27  ;;  %v360_v29 = vpop.f32.mrb[42].mxu0 }
 0x12c   :  { %1366 = vst.msk [vmem:[%s4630_s3 + $0x50] sm:$0xf] %vm1345_vm1, %v2611_v26  ;;  %v595_v30 = vpack.c.bf16 %v360_v29, %v356_v25  ;;  %v2612_v31 = vpack.c.bf16 %v360_v29, %v360_v29  ;;  %1994 = vrot.lane.b32.xlu1 %v2674_v24, %s2773_s25  ;;  %1450 = vrot.lane.b32.xlu0 %v2611_v26, %s2773_s25  ;;  %v362_v32 = vpop.f32.mrb[43].mxu0 }
 0x12d   :  { %2483 = vst.msk [vmem:[%s4630_s3 + $0x250] sm:$0xf] %vm1345_vm1, %v2675_v28  ;;  %v596_v33 = vpack.c.bf16 %v362_v32, %v358_v27  ;;  %v2676_v1 = vpack.c.bf16 %v362_v32, %v362_v32 }
 0x12e   :  { %1367 = vst.msk [vmem:[%s4630_s3 + $0x54] sm:$0xf] %vm1345_vm1, %v2612_v31 }
 0x12f   :  { %2484 = vst.msk [vmem:[%s4630_s3 + $0x254] sm:$0xf] %vm1345_vm1, %v2676_v1  ;;  %879 = vmatprep.mubr.bf16.mxu1 %v596_v33 }
 0x130   :  { %1996 = vrot.lane.b32.xlu0 %v2675_v28, %s2773_s25  ;;  %1452 = vrot.lane.b32.xlu1 %v2612_v31, %s2773_s25 }
 0x131   :  { %880 = vmatmul.mubr.bf16.gmra.mrb[28].mxu1 %v595_v30  ;;  %v366_v34 = vpop.f32.mrb[44].mxu0 }
 0x132   :  { %v2613_v35 = vpack.c.bf16 %v366_v34, %v366_v34  ;;  %v368_v36 = vpop.f32.mrb[45].mxu0 }
 0x133   :  { %v2677_v37 = vpack.c.bf16 %v368_v36, %v368_v36  ;;  %v370_v38 = vpop.f32.mrb[46].mxu0 }
 0x134   :  { %1368 = vst.msk [vmem:[%s4630_s3 + $0x58] sm:$0xf] %vm1345_vm1, %v2613_v35  ;;  %v597_v41 = vpack.c.bf16 %v370_v38, %v366_v34  ;;  %v2614_v42 = vpack.c.bf16 %v370_v38, %v370_v38  ;;  %1998 = vrot.lane.b32.xlu1 %v2676_v1, %s2773_s25  ;;  %1454 = vrot.lane.b32.xlu0 %v2613_v35, %s2773_s25  ;;  %v372_v43 = vpop.f32.mrb[47].mxu0 }
 0x135   :  { %2485 = vst.msk [vmem:[%s4630_s3 + $0x258] sm:$0xf] %vm1345_vm1, %v2677_v37  ;;  %v598_v46 = vpack.c.bf16 %v372_v43, %v368_v36  ;;  %v2678_v49 = vpack.c.bf16 %v372_v43, %v372_v43 }
 0x136   :  { %1369 = vst.msk [vmem:[%s4630_s3 + $0x5c] sm:$0xf] %vm1345_vm1, %v2614_v42 }
 0x137   :  { %2486 = vst.msk [vmem:[%s4630_s3 + $0x25c] sm:$0xf] %vm1345_vm1, %v2678_v49  ;;  %887 = vmatprep.mubr.bf16.mxu1 %v598_v46 }
 0x138   :  { %2000 = vrot.lane.b32.xlu0 %v2677_v37, %s2773_s25  ;;  %1456 = vrot.lane.b32.xlu1 %v2614_v42, %s2773_s25 }
 0x139   :  { %888 = vmatmul.mubr.bf16.gmra.mrb[32].mxu1 %v597_v41  ;;  %v376_v50 = vpop.f32.mrb[48].mxu0 }
 0x13a   :  { %v2615_v40 = vpack.c.bf16 %v376_v50, %v376_v50  ;;  %v378_v47 = vpop.f32.mrb[49].mxu0 }
 0x13b   :  { %v2679_v48 = vpack.c.bf16 %v378_v47, %v378_v47  ;;  %v380_v51 = vpop.f32.mrb[50].mxu0 }
 0x13c   :  { %1370 = vst.msk [vmem:[%s4630_s3 + $0x60] sm:$0xf] %vm1345_vm1, %v2615_v40  ;;  %v599_v53 = vpack.c.bf16 %v380_v51, %v376_v50  ;;  %v2616_v55 = vpack.c.bf16 %v380_v51, %v380_v51  ;;  %2002 = vrot.lane.b32.xlu1 %v2678_v49, %s2773_s25  ;;  %1458 = vrot.lane.b32.xlu0 %v2615_v40, %s2773_s25  ;;  %v382_v39 = vpop.f32.mrb[51].mxu0 }
 0x13d   :  { %2487 = vst.msk [vmem:[%s4630_s3 + $0x260] sm:$0xf] %vm1345_vm1, %v2679_v48  ;;  %v600_v44 = vpack.c.bf16 %v382_v39, %v378_v47  ;;  %v2680_v45 = vpack.c.bf16 %v382_v39, %v382_v39 }
 0x13e   :  { %1371 = vst.msk [vmem:[%s4630_s3 + $0x64] sm:$0xf] %vm1345_vm1, %v2616_v55 }
 0x13f   :  { %2488 = vst.msk [vmem:[%s4630_s3 + $0x264] sm:$0xf] %vm1345_vm1, %v2680_v45  ;;  %895 = vmatprep.mubr.bf16.mxu1 %v600_v44 }
 0x140   :  { %2004 = vrot.lane.b32.xlu0 %v2679_v48, %s2773_s25  ;;  %1460 = vrot.lane.b32.xlu1 %v2616_v55, %s2773_s25 }
 0x141   :  { %896 = vmatmul.mubr.bf16.gmra.mrb[36].mxu1 %v599_v53  ;;  %v386_v56 = vpop.f32.mrb[52].mxu0 }
 0x142   :  { %v2617_v54 = vpack.c.bf16 %v386_v56, %v386_v56  ;;  %v388_v59 = vpop.f32.mrb[53].mxu0 }
 0x143   :  { %v2681_v60 = vpack.c.bf16 %v388_v59, %v388_v59  ;;  %v390_v61 = vpop.f32.mrb[54].mxu0 }
 0x144   :  { %1372 = vst.msk [vmem:[%s4630_s3 + $0x68] sm:$0xf] %vm1345_vm1, %v2617_v54  ;;  %v601_v62 = vpack.c.bf16 %v390_v61, %v386_v56  ;;  %v2618_v63 = vpack.c.bf16 %v390_v61, %v390_v61  ;;  %2006 = vrot.lane.b32.xlu1 %v2680_v45, %s2773_s25  ;;  %1462 = vrot.lane.b32.xlu0 %v2617_v54, %s2773_s25  ;;  %v392_v52 = vpop.f32.mrb[55].mxu0 }
 0x145   :  { %2489 = vst.msk [vmem:[%s4630_s3 + $0x268] sm:$0xf] %vm1345_vm1, %v2681_v60  ;;  %v602_v57 = vpack.c.bf16 %v392_v52, %v388_v59  ;;  %v2682_v58 = vpack.c.bf16 %v392_v52, %v392_v52 }
 0x146   :  { %1373 = vst.msk [vmem:[%s4630_s3 + $0x6c] sm:$0xf] %vm1345_vm1, %v2618_v63 }
 0x147   :  { %2490 = vst.msk [vmem:[%s4630_s3 + $0x26c] sm:$0xf] %vm1345_vm1, %v2682_v58  ;;  %903 = vmatprep.mubr.bf16.mxu1 %v602_v57 }
 0x148   :  { %2008 = vrot.lane.b32.xlu0 %v2681_v60, %s2773_s25  ;;  %1464 = vrot.lane.b32.xlu1 %v2618_v63, %s2773_s25 }
 0x149   :  { %904 = vmatmul.mubr.bf16.gmra.mrb[40].mxu1 %v601_v62  ;;  %v396_v0 = vpop.f32.mrb[56].mxu0 }
 0x14a   :  { %v2619_v3 = vpack.c.bf16 %v396_v0, %v396_v0  ;;  %v398_v4 = vpop.f32.mrb[57].mxu0 }
 0x14b   :  { %v2683_v5 = vpack.c.bf16 %v398_v4, %v398_v4  ;;  %v400_v6 = vpop.f32.mrb[58].mxu0 }
 0x14c   :  { %1374 = vst.msk [vmem:[%s4630_s3 + $0x70] sm:$0xf] %vm1345_vm1, %v2619_v3  ;;  %v603_v9 = vpack.c.bf16 %v400_v6, %v396_v0  ;;  %v2620_v10 = vpack.c.bf16 %v400_v6, %v400_v6  ;;  %2010 = vrot.lane.b32.xlu1 %v2682_v58, %s2773_s25  ;;  %1466 = vrot.lane.b32.xlu0 %v2619_v3, %s2773_s25  ;;  %v402_v11 = vpop.f32.mrb[59].mxu0 }
 0x14d   :  { %2491 = vst.msk [vmem:[%s4630_s3 + $0x270] sm:$0xf] %vm1345_vm1, %v2683_v5  ;;  %v604_v12 = vpack.c.bf16 %v402_v11, %v398_v4  ;;  %v2684_v2 = vpack.c.bf16 %v402_v11, %v402_v11 }
 0x14e   :  { %1375 = vst.msk [vmem:[%s4630_s3 + $0x74] sm:$0xf] %vm1345_vm1, %v2620_v10  ;;  %v1411_v7 = vpop.permute.xlu0 %1410 }
 0x14f   :  { %2492 = vst.msk [vmem:[%s4630_s3 + $0x274] sm:$0xf] %vm1345_vm1, %v2684_v2  ;;  %2335 = vst.msk [vmem:[%s4630_s3 + $0x100] sm:$0xf] %vm1345_vm1, %v1411_v7  ;;  %911 = vmatprep.mubr.bf16.mxu1 %v604_v12 }
 0x150   :  { %2012 = vrot.lane.b32.xlu0 %v2683_v5, %s2773_s25  ;;  %1468 = vrot.lane.b32.xlu1 %v2620_v10, %s2773_s25 }
 0x151   :  { %912 = vmatmul.mubr.bf16.gmra.mrb[44].mxu1 %v603_v9  ;;  %v1959_v8 = vpop.permute.xlu1 %1958  ;;  %v406_v13 = vpop.f32.mrb[60].mxu0 }
 0x152   :  { %2528 = vst.msk [vmem:[%s4630_s3 + $0x304] sm:$0xf] %vm1345_vm1, %v1959_v8  ;;  %v2621_v14 = vpack.c.bf16 %v406_v13, %v406_v13  ;;  %v1957_v15 = vpop.permute.xlu0 %1956  ;;  %v408_v16 = vpop.f32.mrb[61].mxu0 }
 0x153   :  { %2527 = vst.msk [vmem:[%s4630_s3 + $0x300] sm:$0xf] %vm1345_vm1, %v1957_v15  ;;  %v2685_v17 = vpack.c.bf16 %v408_v16, %v408_v16  ;;  %v410_v18 = vpop.f32.mrb[62].mxu0 }
 0x154   :  { %1376 = vst.msk [vmem:[%s4630_s3 + $0x78] sm:$0xf] %vm1345_vm1, %v2621_v14  ;;  %v605_v19 = vpack.c.bf16 %v410_v18, %v406_v13  ;;  %v2622_v20 = vpack.c.bf16 %v410_v18, %v410_v18  ;;  %2014 = vrot.lane.b32.xlu1 %v2684_v2, %s2773_s25  ;;  %1470 = vrot.lane.b32.xlu0 %v2621_v14, %s2773_s25  ;;  %v412_v21 = vpop.f32.mrb[63].mxu0 }
 0x155   :  { %2493 = vst.msk [vmem:[%s4630_s3 + $0x278] sm:$0xf] %vm1345_vm1, %v2685_v17  ;;  %v606_v22 = vpack.c.bf16 %v412_v21, %v408_v16  ;;  %v2686_v23 = vpack.c.bf16 %v412_v21, %v412_v21 }
 0x156   :  { %1377 = vst.msk [vmem:[%s4630_s3 + $0x7c] sm:$0xf] %vm1345_vm1, %v2622_v20  ;;  %v1413_v24 = vpop.permute.xlu0 %1412  ;;  %v1415_v25 = vpop.permute.xlu1 %1414 }
 0x157   :  { %2494 = vst.msk [vmem:[%s4630_s3 + $0x27c] sm:$0xf] %vm1345_vm1, %v2686_v23  ;;  %2336 = vst.msk [vmem:[%s4630_s3 + $0x104] sm:$0xf] %vm1345_vm1, %v1413_v24  ;;  %919 = vmatprep.mubr.bf16.mxu1 %v606_v22 }
 0x158   :  { %2337 = vst.msk [vmem:[%s4630_s3 + $0x108] sm:$0xf] %vm1345_vm1, %v1415_v25  ;;  %2016 = vrot.lane.b32.xlu0 %v2685_v17, %s2773_s25  ;;  %1472 = vrot.lane.b32.xlu1 %v2622_v20, %s2773_s25 }
 0x159   :  { %920 = vmatmul.mubr.bf16.gmra.mrb[48].mxu1 %v605_v19  ;;  %v416_v26 = vpop.f32.mrb[64].mxu0 }
 0x15a   :  { %v2623_v27 = vpack.c.bf16 %v416_v26, %v416_v26  ;;  %v1961_v28 = vpop.permute.xlu0 %1960  ;;  %v1417_v29 = vpop.permute.xlu1 %1416 }
 0x15b   :  { %2529 = vst.msk [vmem:[%s4630_s3 + $0x308] sm:$0xf] %vm1345_vm1, %v1961_v28  ;;  %2338 = vst.msk [vmem:[%s4630_s3 + $0x10c] sm:$0xf] %vm1345_vm1, %v1417_v29  ;;  %v418_v30 = vpop.f32.mrb[65].mxu0 }
 0x15c   :  { %1378 = vst.msk [vmem:[%s4630_s3 + $0x80] sm:$0xf] %vm1345_vm1, %v2623_v27  ;;  %v2687_v31 = vpack.c.bf16 %v418_v30, %v418_v30  ;;  %v420_v32 = vpop.f32.mrb[66].mxu0  ;;  %2018 = vrot.lane.b32.xlu1 %v2686_v23, %s2773_s25  ;;  %1474 = vrot.lane.b32.xlu0 %v2623_v27, %s2773_s25 }
 0x15d   :  { %v607_v33 = vpack.c.bf16 %v420_v32, %v416_v26  ;;  %v2624_v1 = vpack.c.bf16 %v420_v32, %v420_v32  ;;  %v422_v34 = vpop.f32.mrb[67].mxu0 }
 0x15e   :  { %2495 = vst.msk [vmem:[%s4630_s3 + $0x280] sm:$0xf] %vm1345_vm1, %v2687_v31  ;;  %v608_v35 = vpack.c.bf16 %v422_v34, %v418_v30  ;;  %v2688_v36 = vpack.c.bf16 %v422_v34, %v422_v34  ;;  %v1963_v37 = vpop.permute.xlu1 %1962  ;;  %v1419_v38 = vpop.permute.xlu0 %1418 }
 0x15f   :  { %1379 = vst.msk [vmem:[%s4630_s3 + $0x84] sm:$0xf] %vm1345_vm1, %v2624_v1  ;;  %2530 = vst.msk [vmem:[%s4630_s3 + $0x30c] sm:$0xf] %vm1345_vm1, %v1963_v37 }
 0x160   :  { %2339 = vst.msk [vmem:[%s4630_s3 + $0x110] sm:$0xf] %vm1345_vm1, %v1419_v38  ;;  %2496 = vst.msk [vmem:[%s4630_s3 + $0x284] sm:$0xf] %vm1345_vm1, %v2688_v36  ;;  %927 = vmatprep.mubr.bf16.mxu1 %v608_v35  ;;  %2020 = vrot.lane.b32.xlu0 %v2687_v31, %s2773_s25 }
 0x161   :  { %1476 = vrot.lane.b32.xlu1 %v2624_v1, %s2773_s25  ;;  %928 = vmatmul.mubr.bf16.gmra.mrb[52].mxu1 %v607_v33  ;;  %v426_v41 = vpop.f32.mrb[68].mxu0 }
 0x162   :  { %v2625_v42 = vpack.c.bf16 %v426_v41, %v426_v41  ;;  %v1965_v43 = vpop.permute.xlu0 %1964  ;;  %v1421_v46 = vpop.permute.xlu1 %1420 }
 0x163   :  { %2531 = vst.msk [vmem:[%s4630_s3 + $0x310] sm:$0xf] %vm1345_vm1, %v1965_v43  ;;  %2340 = vst.msk [vmem:[%s4630_s3 + $0x114] sm:$0xf] %vm1345_vm1, %v1421_v46  ;;  %v428_v49 = vpop.f32.mrb[69].mxu0 }
 0x164   :  { %1380 = vst.msk [vmem:[%s4630_s3 + $0x88] sm:$0xf] %vm1345_vm1, %v2625_v42  ;;  %v2689_v50 = vpack.c.bf16 %v428_v49, %v428_v49  ;;  %v430_v40 = vpop.f32.mrb[70].mxu0  ;;  %1478 = vrot.lane.b32.xlu0 %v2625_v42, %s2773_s25 }
 0x165   :  { %v609_v47 = vpack.c.bf16 %v430_v40, %v426_v41  ;;  %v2626_v48 = vpack.c.bf16 %v430_v40, %v430_v40  ;;  %2022 = vrot.lane.b32.xlu1 %v2688_v36, %s2773_s25  ;;  %v432_v51 = vpop.f32.mrb[71].mxu0 }
 0x166   :  { %2497 = vst.msk [vmem:[%s4630_s3 + $0x288] sm:$0xf] %vm1345_vm1, %v2689_v50  ;;  %v610_v53 = vpack.c.bf16 %v432_v51, %v428_v49  ;;  %v2690_v55 = vpack.c.bf16 %v432_v51, %v432_v51  ;;  %v1967_v39 = vpop.permute.xlu1 %1966  ;;  %v1423_v44 = vpop.permute.xlu0 %1422 }
 0x167   :  { %1381 = vst.msk [vmem:[%s4630_s3 + $0x8c] sm:$0xf] %vm1345_vm1, %v2626_v48  ;;  %2532 = vst.msk [vmem:[%s4630_s3 + $0x314] sm:$0xf] %vm1345_vm1, %v1967_v39 }
 0x168   :  { %2341 = vst.msk [vmem:[%s4630_s3 + $0x118] sm:$0xf] %vm1345_vm1, %v1423_v44  ;;  %2498 = vst.msk [vmem:[%s4630_s3 + $0x28c] sm:$0xf] %vm1345_vm1, %v2690_v55  ;;  %935 = vmatprep.mubr.bf16.mxu1 %v610_v53  ;;  %2024 = vrot.lane.b32.xlu0 %v2689_v50, %s2773_s25 }
 0x169   :  { %1480 = vrot.lane.b32.xlu1 %v2626_v48, %s2773_s25  ;;  %936 = vmatmul.mubr.bf16.gmra.mrb[56].mxu1 %v609_v47  ;;  %v436_v45 = vpop.f32.mrb[72].mxu0 }
 0x16a   :  { %v2627_v56 = vpack.c.bf16 %v436_v45, %v436_v45  ;;  %v1969_v54 = vpop.permute.xlu0 %1968  ;;  %v1425_v59 = vpop.permute.xlu1 %1424 }
 0x16b   :  { %2533 = vst.msk [vmem:[%s4630_s3 + $0x318] sm:$0xf] %vm1345_vm1, %v1969_v54  ;;  %2342 = vst.msk [vmem:[%s4630_s3 + $0x11c] sm:$0xf] %vm1345_vm1, %v1425_v59  ;;  %v438_v60 = vpop.f32.mrb[73].mxu0 }
 0x16c   :  { %1382 = vst.msk [vmem:[%s4630_s3 + $0x90] sm:$0xf] %vm1345_vm1, %v2627_v56  ;;  %v2691_v61 = vpack.c.bf16 %v438_v60, %v438_v60  ;;  %v440_v62 = vpop.f32.mrb[74].mxu0  ;;  %1482 = vrot.lane.b32.xlu0 %v2627_v56, %s2773_s25 }
 0x16d   :  { %v611_v63 = vpack.c.bf16 %v440_v62, %v436_v45  ;;  %v2628_v52 = vpack.c.bf16 %v440_v62, %v440_v62  ;;  %2026 = vrot.lane.b32.xlu1 %v2690_v55, %s2773_s25  ;;  %v442_v57 = vpop.f32.mrb[75].mxu0 }
 0x16e   :  { %2499 = vst.msk [vmem:[%s4630_s3 + $0x290] sm:$0xf] %vm1345_vm1, %v2691_v61  ;;  %v612_v58 = vpack.c.bf16 %v442_v57, %v438_v60  ;;  %v2692_v0 = vpack.c.bf16 %v442_v57, %v442_v57  ;;  %v1971_v3 = vpop.permute.xlu1 %1970  ;;  %v1427_v4 = vpop.permute.xlu0 %1426 }
 0x16f   :  { %1383 = vst.msk [vmem:[%s4630_s3 + $0x94] sm:$0xf] %vm1345_vm1, %v2628_v52  ;;  %2534 = vst.msk [vmem:[%s4630_s3 + $0x31c] sm:$0xf] %vm1345_vm1, %v1971_v3 }
 0x170   :  { %2343 = vst.msk [vmem:[%s4630_s3 + $0x120] sm:$0xf] %vm1345_vm1, %v1427_v4  ;;  %2500 = vst.msk [vmem:[%s4630_s3 + $0x294] sm:$0xf] %vm1345_vm1, %v2692_v0  ;;  %943 = vmatprep.mubr.bf16.mxu1 %v612_v58  ;;  %2028 = vrot.lane.b32.xlu0 %v2691_v61, %s2773_s25 }
 0x171   :  { %1484 = vrot.lane.b32.xlu1 %v2628_v52, %s2773_s25  ;;  %944 = vmatmul.mubr.bf16.gmra.mrb[60].mxu1 %v611_v63  ;;  %v446_v5 = vpop.f32.mrb[76].mxu0 }
 0x172   :  { %v2629_v6 = vpack.c.bf16 %v446_v5, %v446_v5  ;;  %v1973_v9 = vpop.permute.xlu0 %1972  ;;  %v1429_v10 = vpop.permute.xlu1 %1428 }
 0x173   :  { %2535 = vst.msk [vmem:[%s4630_s3 + $0x320] sm:$0xf] %vm1345_vm1, %v1973_v9  ;;  %2344 = vst.msk [vmem:[%s4630_s3 + $0x124] sm:$0xf] %vm1345_vm1, %v1429_v10  ;;  %v448_v11 = vpop.f32.mrb[77].mxu0 }
 0x174   :  { %1384 = vst.msk [vmem:[%s4630_s3 + $0x98] sm:$0xf] %vm1345_vm1, %v2629_v6  ;;  %v2693_v12 = vpack.c.bf16 %v448_v11, %v448_v11  ;;  %v450_v2 = vpop.f32.mrb[78].mxu0  ;;  %1486 = vrot.lane.b32.xlu0 %v2629_v6, %s2773_s25 }
 0x175   :  { %v613_v7 = vpack.c.bf16 %v450_v2, %v446_v5  ;;  %v2630_v8 = vpack.c.bf16 %v450_v2, %v450_v2  ;;  %2030 = vrot.lane.b32.xlu1 %v2692_v0, %s2773_s25  ;;  %v452_v13 = vpop.f32.mrb[79].mxu0 }
 0x176   :  { %2501 = vst.msk [vmem:[%s4630_s3 + $0x298] sm:$0xf] %vm1345_vm1, %v2693_v12  ;;  %v614_v14 = vpack.c.bf16 %v452_v13, %v448_v11  ;;  %v2694_v15 = vpack.c.bf16 %v452_v13, %v452_v13  ;;  %v1975_v16 = vpop.permute.xlu1 %1974  ;;  %v1431_v17 = vpop.permute.xlu0 %1430 }
 0x177   :  { %1385 = vst.msk [vmem:[%s4630_s3 + $0x9c] sm:$0xf] %vm1345_vm1, %v2630_v8  ;;  %2536 = vst.msk [vmem:[%s4630_s3 + $0x324] sm:$0xf] %vm1345_vm1, %v1975_v16 }
 0x178   :  { %2345 = vst.msk [vmem:[%s4630_s3 + $0x128] sm:$0xf] %vm1345_vm1, %v1431_v17  ;;  %2502 = vst.msk [vmem:[%s4630_s3 + $0x29c] sm:$0xf] %vm1345_vm1, %v2694_v15  ;;  %951 = vmatprep.mubr.bf16.mxu1 %v614_v14  ;;  %2032 = vrot.lane.b32.xlu0 %v2693_v12, %s2773_s25 }
 0x179   :  { %1488 = vrot.lane.b32.xlu1 %v2630_v8, %s2773_s25  ;;  %952 = vmatmul.mubr.bf16.gmra.mrb[64].mxu1 %v613_v7  ;;  %v456_v18 = vpop.f32.mrb[80].mxu0 }
 0x17a   :  { %v2631_v19 = vpack.c.bf16 %v456_v18, %v456_v18  ;;  %v1977_v20 = vpop.permute.xlu0 %1976  ;;  %v1433_v21 = vpop.permute.xlu1 %1432 }
 0x17b   :  { %2537 = vst.msk [vmem:[%s4630_s3 + $0x328] sm:$0xf] %vm1345_vm1, %v1977_v20  ;;  %2346 = vst.msk [vmem:[%s4630_s3 + $0x12c] sm:$0xf] %vm1345_vm1, %v1433_v21  ;;  %v458_v22 = vpop.f32.mrb[81].mxu0 }
 0x17c   :  { %1386 = vst.msk [vmem:[%s4630_s3 + $0xa0] sm:$0xf] %vm1345_vm1, %v2631_v19  ;;  %v2695_v23 = vpack.c.bf16 %v458_v22, %v458_v22  ;;  %v460_v24 = vpop.f32.mrb[82].mxu0  ;;  %1490 = vrot.lane.b32.xlu0 %v2631_v19, %s2773_s25 }
 0x17d   :  { %v615_v25 = vpack.c.bf16 %v460_v24, %v456_v18  ;;  %v2632_v26 = vpack.c.bf16 %v460_v24, %v460_v24  ;;  %2034 = vrot.lane.b32.xlu1 %v2694_v15, %s2773_s25  ;;  %v462_v27 = vpop.f32.mrb[83].mxu0 }
 0x17e   :  { %2503 = vst.msk [vmem:[%s4630_s3 + $0x2a0] sm:$0xf] %vm1345_vm1, %v2695_v23  ;;  %v616_v28 = vpack.c.bf16 %v462_v27, %v458_v22  ;;  %v2696_v29 = vpack.c.bf16 %v462_v27, %v462_v27  ;;  %v1979_v30 = vpop.permute.xlu1 %1978  ;;  %v1435_v31 = vpop.permute.xlu0 %1434 }
 0x17f   :  { %1387 = vst.msk [vmem:[%s4630_s3 + $0xa4] sm:$0xf] %vm1345_vm1, %v2632_v26  ;;  %2538 = vst.msk [vmem:[%s4630_s3 + $0x32c] sm:$0xf] %vm1345_vm1, %v1979_v30 }
 0x180   :  { %2347 = vst.msk [vmem:[%s4630_s3 + $0x130] sm:$0xf] %vm1345_vm1, %v1435_v31  ;;  %2504 = vst.msk [vmem:[%s4630_s3 + $0x2a4] sm:$0xf] %vm1345_vm1, %v2696_v29  ;;  %959 = vmatprep.mubr.bf16.mxu1 %v616_v28  ;;  %2036 = vrot.lane.b32.xlu0 %v2695_v23, %s2773_s25 }
 0x181   :  { %1492 = vrot.lane.b32.xlu1 %v2632_v26, %s2773_s25  ;;  %960 = vmatmul.mubr.bf16.gmra.mrb[68].mxu1 %v615_v25  ;;  %v466_v32 = vpop.f32.mrb[84].mxu0 }
 0x182   :  { %v2633_v33 = vpack.c.bf16 %v466_v32, %v466_v32  ;;  %v1981_v1 = vpop.permute.xlu0 %1980  ;;  %v1437_v34 = vpop.permute.xlu1 %1436 }
 0x183   :  { %2539 = vst.msk [vmem:[%s4630_s3 + $0x330] sm:$0xf] %vm1345_vm1, %v1981_v1  ;;  %2348 = vst.msk [vmem:[%s4630_s3 + $0x134] sm:$0xf] %vm1345_vm1, %v1437_v34  ;;  %v468_v35 = vpop.f32.mrb[85].mxu0 }
 0x184   :  { %1388 = vst.msk [vmem:[%s4630_s3 + $0xa8] sm:$0xf] %vm1345_vm1, %v2633_v33  ;;  %v2697_v36 = vpack.c.bf16 %v468_v35, %v468_v35  ;;  %v470_v37 = vpop.f32.mrb[86].mxu0  ;;  %1494 = vrot.lane.b32.xlu0 %v2633_v33, %s2773_s25 }
 0x185   :  { %v617_v38 = vpack.c.bf16 %v470_v37, %v466_v32  ;;  %v2634_v41 = vpack.c.bf16 %v470_v37, %v470_v37  ;;  %2038 = vrot.lane.b32.xlu1 %v2696_v29, %s2773_s25  ;;  %v472_v42 = vpop.f32.mrb[87].mxu0 }
 0x186   :  { %2505 = vst.msk [vmem:[%s4630_s3 + $0x2a8] sm:$0xf] %vm1345_vm1, %v2697_v36  ;;  %v618_v43 = vpack.c.bf16 %v472_v42, %v468_v35  ;;  %v2698_v46 = vpack.c.bf16 %v472_v42, %v472_v42  ;;  %v1983_v49 = vpop.permute.xlu1 %1982  ;;  %v1439_v50 = vpop.permute.xlu0 %1438 }
 0x187   :  { %1389 = vst.msk [vmem:[%s4630_s3 + $0xac] sm:$0xf] %vm1345_vm1, %v2634_v41  ;;  %2540 = vst.msk [vmem:[%s4630_s3 + $0x334] sm:$0xf] %vm1345_vm1, %v1983_v49 }
 0x188   :  { %2349 = vst.msk [vmem:[%s4630_s3 + $0x138] sm:$0xf] %vm1345_vm1, %v1439_v50  ;;  %2506 = vst.msk [vmem:[%s4630_s3 + $0x2ac] sm:$0xf] %vm1345_vm1, %v2698_v46  ;;  %967 = vmatprep.mubr.bf16.mxu1 %v618_v43  ;;  %2040 = vrot.lane.b32.xlu0 %v2697_v36, %s2773_s25 }
 0x189   :  { %1496 = vrot.lane.b32.xlu1 %v2634_v41, %s2773_s25  ;;  %968 = vmatmul.mubr.bf16.gmra.mrb[72].mxu1 %v617_v38  ;;  %v476_v40 = vpop.f32.mrb[88].mxu0 }
 0x18a   :  { %v2635_v47 = vpack.c.bf16 %v476_v40, %v476_v40  ;;  %v1985_v48 = vpop.permute.xlu0 %1984  ;;  %v1441_v51 = vpop.permute.xlu1 %1440 }
 0x18b   :  { %2541 = vst.msk [vmem:[%s4630_s3 + $0x338] sm:$0xf] %vm1345_vm1, %v1985_v48  ;;  %2350 = vst.msk [vmem:[%s4630_s3 + $0x13c] sm:$0xf] %vm1345_vm1, %v1441_v51  ;;  %v478_v53 = vpop.f32.mrb[89].mxu0 }
 0x18c   :  { %1390 = vst.msk [vmem:[%s4630_s3 + $0xb0] sm:$0xf] %vm1345_vm1, %v2635_v47  ;;  %v2699_v55 = vpack.c.bf16 %v478_v53, %v478_v53  ;;  %v480_v39 = vpop.f32.mrb[90].mxu0  ;;  %1498 = vrot.lane.b32.xlu0 %v2635_v47, %s2773_s25 }
 0x18d   :  { %v619_v44 = vpack.c.bf16 %v480_v39, %v476_v40  ;;  %v2636_v45 = vpack.c.bf16 %v480_v39, %v480_v39  ;;  %2042 = vrot.lane.b32.xlu1 %v2698_v46, %s2773_s25  ;;  %v482_v56 = vpop.f32.mrb[91].mxu0 }
 0x18e   :  { %2507 = vst.msk [vmem:[%s4630_s3 + $0x2b0] sm:$0xf] %vm1345_vm1, %v2699_v55  ;;  %v620_v54 = vpack.c.bf16 %v482_v56, %v478_v53  ;;  %v2700_v59 = vpack.c.bf16 %v482_v56, %v482_v56  ;;  %v1987_v60 = vpop.permute.xlu1 %1986  ;;  %v1443_v61 = vpop.permute.xlu0 %1442 }
 0x18f   :  { %1391 = vst.msk [vmem:[%s4630_s3 + $0xb4] sm:$0xf] %vm1345_vm1, %v2636_v45  ;;  %2542 = vst.msk [vmem:[%s4630_s3 + $0x33c] sm:$0xf] %vm1345_vm1, %v1987_v60 }
 0x190   :  { %2351 = vst.msk [vmem:[%s4630_s3 + $0x140] sm:$0xf] %vm1345_vm1, %v1443_v61  ;;  %2508 = vst.msk [vmem:[%s4630_s3 + $0x2b4] sm:$0xf] %vm1345_vm1, %v2700_v59  ;;  %975 = vmatprep.mubr.bf16.mxu1 %v620_v54  ;;  %2044 = vrot.lane.b32.xlu0 %v2699_v55, %s2773_s25 }
 0x191   :  { %1500 = vrot.lane.b32.xlu1 %v2636_v45, %s2773_s25  ;;  %976 = vmatmul.mubr.bf16.gmra.mrb[76].mxu1 %v619_v44  ;;  %v486_v62 = vpop.f32.mrb[92].mxu0 }
 0x192   :  { %v2637_v63 = vpack.c.bf16 %v486_v62, %v486_v62  ;;  %v1989_v52 = vpop.permute.xlu0 %1988  ;;  %v1445_v57 = vpop.permute.xlu1 %1444 }
 0x193   :  { %2543 = vst.msk [vmem:[%s4630_s3 + $0x340] sm:$0xf] %vm1345_vm1, %v1989_v52  ;;  %2352 = vst.msk [vmem:[%s4630_s3 + $0x144] sm:$0xf] %vm1345_vm1, %v1445_v57  ;;  %v488_v58 = vpop.f32.mrb[93].mxu0 }
 0x194   :  { %1392 = vst.msk [vmem:[%s4630_s3 + $0xb8] sm:$0xf] %vm1345_vm1, %v2637_v63  ;;  %v2701_v0 = vpack.c.bf16 %v488_v58, %v488_v58  ;;  %v490_v3 = vpop.f32.mrb[94].mxu0  ;;  %1502 = vrot.lane.b32.xlu0 %v2637_v63, %s2773_s25 }
 0x195   :  { %v621_v4 = vpack.c.bf16 %v490_v3, %v486_v62  ;;  %v2638_v5 = vpack.c.bf16 %v490_v3, %v490_v3  ;;  %2046 = vrot.lane.b32.xlu1 %v2700_v59, %s2773_s25  ;;  %v492_v6 = vpop.f32.mrb[95].mxu0 }
 0x196   :  { %2509 = vst.msk [vmem:[%s4630_s3 + $0x2b8] sm:$0xf] %vm1345_vm1, %v2701_v0  ;;  %v622_v9 = vpack.c.bf16 %v492_v6, %v488_v58  ;;  %v2702_v10 = vpack.c.bf16 %v492_v6, %v492_v6  ;;  %v1991_v11 = vpop.permute.xlu1 %1990  ;;  %v1447_v12 = vpop.permute.xlu0 %1446 }
 0x197   :  { %1393 = vst.msk [vmem:[%s4630_s3 + $0xbc] sm:$0xf] %vm1345_vm1, %v2638_v5  ;;  %2544 = vst.msk [vmem:[%s4630_s3 + $0x344] sm:$0xf] %vm1345_vm1, %v1991_v11 }
 0x198   :  { %2353 = vst.msk [vmem:[%s4630_s3 + $0x148] sm:$0xf] %vm1345_vm1, %v1447_v12  ;;  %2510 = vst.msk [vmem:[%s4630_s3 + $0x2bc] sm:$0xf] %vm1345_vm1, %v2702_v10  ;;  %983 = vmatprep.mubr.bf16.mxu1 %v622_v9  ;;  %2048 = vrot.lane.b32.xlu0 %v2701_v0, %s2773_s25 }
 0x199   :  { %1504 = vrot.lane.b32.xlu1 %v2638_v5, %s2773_s25  ;;  %984 = vmatmul.mubr.bf16.gmra.mrb[80].mxu1 %v621_v4  ;;  %v496_v2 = vpop.f32.mrb[96].mxu0 }
 0x19a   :  { %v2639_v7 = vpack.c.bf16 %v496_v2, %v496_v2  ;;  %v1993_v8 = vpop.permute.xlu0 %1992  ;;  %v1449_v13 = vpop.permute.xlu1 %1448 }
 0x19b   :  { %2545 = vst.msk [vmem:[%s4630_s3 + $0x348] sm:$0xf] %vm1345_vm1, %v1993_v8  ;;  %2354 = vst.msk [vmem:[%s4630_s3 + $0x14c] sm:$0xf] %vm1345_vm1, %v1449_v13  ;;  %v498_v14 = vpop.f32.mrb[97].mxu0 }
 0x19c   :  { %1394 = vst.msk [vmem:[%s4630_s3 + $0xc0] sm:$0xf] %vm1345_vm1, %v2639_v7  ;;  %v2703_v15 = vpack.c.bf16 %v498_v14, %v498_v14  ;;  %v500_v16 = vpop.f32.mrb[98].mxu0  ;;  %1506 = vrot.lane.b32.xlu0 %v2639_v7, %s2773_s25 }
 0x19d   :  { %v623_v17 = vpack.c.bf16 %v500_v16, %v496_v2  ;;  %v2640_v18 = vpack.c.bf16 %v500_v16, %v500_v16  ;;  %2050 = vrot.lane.b32.xlu1 %v2702_v10, %s2773_s25  ;;  %v502_v19 = vpop.f32.mrb[99].mxu0 }
 0x19e   :  { %2511 = vst.msk [vmem:[%s4630_s3 + $0x2c0] sm:$0xf] %vm1345_vm1, %v2703_v15  ;;  %v624_v20 = vpack.c.bf16 %v502_v19, %v498_v14  ;;  %v2704_v21 = vpack.c.bf16 %v502_v19, %v502_v19  ;;  %v1995_v22 = vpop.permute.xlu1 %1994  ;;  %v1451_v23 = vpop.permute.xlu0 %1450 }
 0x19f   :  { %1395 = vst.msk [vmem:[%s4630_s3 + $0xc4] sm:$0xf] %vm1345_vm1, %v2640_v18  ;;  %2546 = vst.msk [vmem:[%s4630_s3 + $0x34c] sm:$0xf] %vm1345_vm1, %v1995_v22 }
 0x1a0   :  { %2355 = vst.msk [vmem:[%s4630_s3 + $0x150] sm:$0xf] %vm1345_vm1, %v1451_v23  ;;  %2512 = vst.msk [vmem:[%s4630_s3 + $0x2c4] sm:$0xf] %vm1345_vm1, %v2704_v21  ;;  %991 = vmatprep.mubr.bf16.mxu1 %v624_v20  ;;  %2052 = vrot.lane.b32.xlu0 %v2703_v15, %s2773_s25 }
 0x1a1   :  { %1508 = vrot.lane.b32.xlu1 %v2640_v18, %s2773_s25  ;;  %992 = vmatmul.mubr.bf16.gmra.mrb[84].mxu1 %v623_v17  ;;  %v506_v24 = vpop.f32.mrb[100].mxu0 }
 0x1a2   :  { %v2641_v25 = vpack.c.bf16 %v506_v24, %v506_v24  ;;  %v1997_v26 = vpop.permute.xlu0 %1996  ;;  %v1453_v27 = vpop.permute.xlu1 %1452 }
 0x1a3   :  { %2547 = vst.msk [vmem:[%s4630_s3 + $0x350] sm:$0xf] %vm1345_vm1, %v1997_v26  ;;  %2356 = vst.msk [vmem:[%s4630_s3 + $0x154] sm:$0xf] %vm1345_vm1, %v1453_v27  ;;  %v508_v28 = vpop.f32.mrb[101].mxu0 }
 0x1a4   :  { %1396 = vst.msk [vmem:[%s4630_s3 + $0xc8] sm:$0xf] %vm1345_vm1, %v2641_v25  ;;  %v2705_v29 = vpack.c.bf16 %v508_v28, %v508_v28  ;;  %v510_v30 = vpop.f32.mrb[102].mxu0  ;;  %1510 = vrot.lane.b32.xlu0 %v2641_v25, %s2773_s25 }
 0x1a5   :  { %v625_v31 = vpack.c.bf16 %v510_v30, %v506_v24  ;;  %v2642_v32 = vpack.c.bf16 %v510_v30, %v510_v30  ;;  %2054 = vrot.lane.b32.xlu1 %v2704_v21, %s2773_s25  ;;  %v512_v33 = vpop.f32.mrb[103].mxu0 }
 0x1a6   :  { %2513 = vst.msk [vmem:[%s4630_s3 + $0x2c8] sm:$0xf] %vm1345_vm1, %v2705_v29  ;;  %v626_v1 = vpack.c.bf16 %v512_v33, %v508_v28  ;;  %v2706_v34 = vpack.c.bf16 %v512_v33, %v512_v33  ;;  %v1999_v35 = vpop.permute.xlu1 %1998  ;;  %v1455_v36 = vpop.permute.xlu0 %1454 }
 0x1a7   :  { %1397 = vst.msk [vmem:[%s4630_s3 + $0xcc] sm:$0xf] %vm1345_vm1, %v2642_v32  ;;  %2548 = vst.msk [vmem:[%s4630_s3 + $0x354] sm:$0xf] %vm1345_vm1, %v1999_v35 }
 0x1a8   :  { %2357 = vst.msk [vmem:[%s4630_s3 + $0x158] sm:$0xf] %vm1345_vm1, %v1455_v36  ;;  %2514 = vst.msk [vmem:[%s4630_s3 + $0x2cc] sm:$0xf] %vm1345_vm1, %v2706_v34  ;;  %999 = vmatprep.mubr.bf16.mxu1 %v626_v1  ;;  %2056 = vrot.lane.b32.xlu0 %v2705_v29, %s2773_s25 }
 0x1a9   :  { %1512 = vrot.lane.b32.xlu1 %v2642_v32, %s2773_s25  ;;  %1000 = vmatmul.mubr.bf16.gmra.mrb[88].mxu1 %v625_v31  ;;  %v516_v37 = vpop.f32.mrb[104].mxu0 }
 0x1aa   :  { %v2643_v38 = vpack.c.bf16 %v516_v37, %v516_v37  ;;  %v2001_v41 = vpop.permute.xlu0 %2000  ;;  %v1457_v42 = vpop.permute.xlu1 %1456 }
 0x1ab   :  { %2549 = vst.msk [vmem:[%s4630_s3 + $0x358] sm:$0xf] %vm1345_vm1, %v2001_v41  ;;  %2358 = vst.msk [vmem:[%s4630_s3 + $0x15c] sm:$0xf] %vm1345_vm1, %v1457_v42  ;;  %v518_v43 = vpop.f32.mrb[105].mxu0 }
 0x1ac   :  { %1398 = vst.msk [vmem:[%s4630_s3 + $0xd0] sm:$0xf] %vm1345_vm1, %v2643_v38  ;;  %v2707_v46 = vpack.c.bf16 %v518_v43, %v518_v43  ;;  %v520_v49 = vpop.f32.mrb[106].mxu0  ;;  %1514 = vrot.lane.b32.xlu0 %v2643_v38, %s2773_s25 }
 0x1ad   :  { %v627_v50 = vpack.c.bf16 %v520_v49, %v516_v37  ;;  %v2644_v40 = vpack.c.bf16 %v520_v49, %v520_v49  ;;  %2058 = vrot.lane.b32.xlu1 %v2706_v34, %s2773_s25  ;;  %v522_v47 = vpop.f32.mrb[107].mxu0 }
 0x1ae   :  { %2515 = vst.msk [vmem:[%s4630_s3 + $0x2d0] sm:$0xf] %vm1345_vm1, %v2707_v46  ;;  %v628_v48 = vpack.c.bf16 %v522_v47, %v518_v43  ;;  %v2708_v51 = vpack.c.bf16 %v522_v47, %v522_v47  ;;  %v2003_v53 = vpop.permute.xlu1 %2002  ;;  %v1459_v55 = vpop.permute.xlu0 %1458 }
 0x1af   :  { %1399 = vst.msk [vmem:[%s4630_s3 + $0xd4] sm:$0xf] %vm1345_vm1, %v2644_v40  ;;  %2550 = vst.msk [vmem:[%s4630_s3 + $0x35c] sm:$0xf] %vm1345_vm1, %v2003_v53 }
 0x1b0   :  { %2359 = vst.msk [vmem:[%s4630_s3 + $0x160] sm:$0xf] %vm1345_vm1, %v1459_v55  ;;  %2516 = vst.msk [vmem:[%s4630_s3 + $0x2d4] sm:$0xf] %vm1345_vm1, %v2708_v51  ;;  %1007 = vmatprep.mubr.bf16.mxu1 %v628_v48  ;;  %2060 = vrot.lane.b32.xlu0 %v2707_v46, %s2773_s25 }
 0x1b1   :  { %1516 = vrot.lane.b32.xlu1 %v2644_v40, %s2773_s25  ;;  %1008 = vmatmul.mubr.bf16.gmra.mrb[92].mxu1 %v627_v50  ;;  %v526_v39 = vpop.f32.mrb[108].mxu0 }
 0x1b2   :  { %v2645_v44 = vpack.c.bf16 %v526_v39, %v526_v39  ;;  %v2005_v45 = vpop.permute.xlu0 %2004  ;;  %v1461_v56 = vpop.permute.xlu1 %1460 }
 0x1b3   :  { %2551 = vst.msk [vmem:[%s4630_s3 + $0x360] sm:$0xf] %vm1345_vm1, %v2005_v45  ;;  %2360 = vst.msk [vmem:[%s4630_s3 + $0x164] sm:$0xf] %vm1345_vm1, %v1461_v56  ;;  %v528_v54 = vpop.f32.mrb[109].mxu0 }
 0x1b4   :  { %1400 = vst.msk [vmem:[%s4630_s3 + $0xd8] sm:$0xf] %vm1345_vm1, %v2645_v44  ;;  %v2709_v59 = vpack.c.bf16 %v528_v54, %v528_v54  ;;  %v530_v60 = vpop.f32.mrb[110].mxu0  ;;  %1518 = vrot.lane.b32.xlu0 %v2645_v44, %s2773_s25 }
 0x1b5   :  { %v629_v61 = vpack.c.bf16 %v530_v60, %v526_v39  ;;  %v2646_v62 = vpack.c.bf16 %v530_v60, %v530_v60  ;;  %2062 = vrot.lane.b32.xlu1 %v2708_v51, %s2773_s25  ;;  %v532_v63 = vpop.f32.mrb[111].mxu0 }
 0x1b6   :  { %2517 = vst.msk [vmem:[%s4630_s3 + $0x2d8] sm:$0xf] %vm1345_vm1, %v2709_v59  ;;  %v630_v52 = vpack.c.bf16 %v532_v63, %v528_v54  ;;  %v2710_v57 = vpack.c.bf16 %v532_v63, %v532_v63  ;;  %v2007_v58 = vpop.permute.xlu1 %2006  ;;  %v1463_v0 = vpop.permute.xlu0 %1462 }
 0x1b7   :  { %1401 = vst.msk [vmem:[%s4630_s3 + $0xdc] sm:$0xf] %vm1345_vm1, %v2646_v62  ;;  %2552 = vst.msk [vmem:[%s4630_s3 + $0x364] sm:$0xf] %vm1345_vm1, %v2007_v58 }
 0x1b8   :  { %2361 = vst.msk [vmem:[%s4630_s3 + $0x168] sm:$0xf] %vm1345_vm1, %v1463_v0  ;;  %2518 = vst.msk [vmem:[%s4630_s3 + $0x2dc] sm:$0xf] %vm1345_vm1, %v2710_v57  ;;  %1015 = vmatprep.mubr.bf16.mxu1 %v630_v52  ;;  %2064 = vrot.lane.b32.xlu0 %v2709_v59, %s2773_s25 }
 0x1b9   :  { %1520 = vrot.lane.b32.xlu1 %v2646_v62, %s2773_s25  ;;  %1016 = vmatmul.mubr.bf16.gmra.mrb[96].mxu1 %v629_v61  ;;  %v536_v3 = vpop.f32.mrb[112].mxu0 }
 0x1ba   :  { %v2647_v4 = vpack.c.bf16 %v536_v3, %v536_v3  ;;  %v2009_v5 = vpop.permute.xlu0 %2008  ;;  %v1465_v6 = vpop.permute.xlu1 %1464 }
 0x1bb   :  { %2553 = vst.msk [vmem:[%s4630_s3 + $0x368] sm:$0xf] %vm1345_vm1, %v2009_v5  ;;  %2362 = vst.msk [vmem:[%s4630_s3 + $0x16c] sm:$0xf] %vm1345_vm1, %v1465_v6  ;;  %v538_v9 = vpop.f32.mrb[113].mxu0 }
 0x1bc   :  { %1402 = vst.msk [vmem:[%s4630_s3 + $0xe0] sm:$0xf] %vm1345_vm1, %v2647_v4  ;;  %v2711_v10 = vpack.c.bf16 %v538_v9, %v538_v9  ;;  %v540_v11 = vpop.f32.mrb[114].mxu0  ;;  %1522 = vrot.lane.b32.xlu0 %v2647_v4, %s2773_s25 }
 0x1bd   :  { %v631_v12 = vpack.c.bf16 %v540_v11, %v536_v3  ;;  %v2648_v2 = vpack.c.bf16 %v540_v11, %v540_v11  ;;  %2066 = vrot.lane.b32.xlu1 %v2710_v57, %s2773_s25  ;;  %v542_v7 = vpop.f32.mrb[115].mxu0 }
 0x1be   :  { %2519 = vst.msk [vmem:[%s4630_s3 + $0x2e0] sm:$0xf] %vm1345_vm1, %v2711_v10  ;;  %v632_v8 = vpack.c.bf16 %v542_v7, %v538_v9  ;;  %v2712_v13 = vpack.c.bf16 %v542_v7, %v542_v7  ;;  %v2011_v14 = vpop.permute.xlu1 %2010  ;;  %v1467_v15 = vpop.permute.xlu0 %1466 }
 0x1bf   :  { %1403 = vst.msk [vmem:[%s4630_s3 + $0xe4] sm:$0xf] %vm1345_vm1, %v2648_v2  ;;  %2554 = vst.msk [vmem:[%s4630_s3 + $0x36c] sm:$0xf] %vm1345_vm1, %v2011_v14 }
 0x1c0   :  { %2363 = vst.msk [vmem:[%s4630_s3 + $0x170] sm:$0xf] %vm1345_vm1, %v1467_v15  ;;  %2520 = vst.msk [vmem:[%s4630_s3 + $0x2e4] sm:$0xf] %vm1345_vm1, %v2712_v13  ;;  %1023 = vmatprep.mubr.bf16.mxu1 %v632_v8  ;;  %2068 = vrot.lane.b32.xlu0 %v2711_v10, %s2773_s25 }
 0x1c1   :  { %1524 = vrot.lane.b32.xlu1 %v2648_v2, %s2773_s25  ;;  %1024 = vmatmul.mubr.bf16.gmra.mrb[100].mxu1 %v631_v12  ;;  %v546_v16 = vpop.f32.mrb[116].mxu0 }
 0x1c2   :  { %v2649_v17 = vpack.c.bf16 %v546_v16, %v546_v16  ;;  %v2013_v18 = vpop.permute.xlu0 %2012  ;;  %v1469_v19 = vpop.permute.xlu1 %1468 }
 0x1c3   :  { %2555 = vst.msk [vmem:[%s4630_s3 + $0x370] sm:$0xf] %vm1345_vm1, %v2013_v18  ;;  %2364 = vst.msk [vmem:[%s4630_s3 + $0x174] sm:$0xf] %vm1345_vm1, %v1469_v19  ;;  %v548_v20 = vpop.f32.mrb[117].mxu0 }
 0x1c4   :  { %1404 = vst.msk [vmem:[%s4630_s3 + $0xe8] sm:$0xf] %vm1345_vm1, %v2649_v17  ;;  %v2713_v21 = vpack.c.bf16 %v548_v20, %v548_v20  ;;  %v550_v22 = vpop.f32.mrb[118].mxu0  ;;  %1526 = vrot.lane.b32.xlu0 %v2649_v17, %s2773_s25 }
 0x1c5   :  { %v633_v23 = vpack.c.bf16 %v550_v22, %v546_v16  ;;  %v2650_v24 = vpack.c.bf16 %v550_v22, %v550_v22  ;;  %2070 = vrot.lane.b32.xlu1 %v2712_v13, %s2773_s25  ;;  %v552_v25 = vpop.f32.mrb[119].mxu0 }
 0x1c6   :  { %2521 = vst.msk [vmem:[%s4630_s3 + $0x2e8] sm:$0xf] %vm1345_vm1, %v2713_v21  ;;  %v634_v26 = vpack.c.bf16 %v552_v25, %v548_v20  ;;  %v2714_v27 = vpack.c.bf16 %v552_v25, %v552_v25  ;;  %v2015_v28 = vpop.permute.xlu1 %2014  ;;  %v1471_v29 = vpop.permute.xlu0 %1470 }
 0x1c7   :  { %1405 = vst.msk [vmem:[%s4630_s3 + $0xec] sm:$0xf] %vm1345_vm1, %v2650_v24  ;;  %2556 = vst.msk [vmem:[%s4630_s3 + $0x374] sm:$0xf] %vm1345_vm1, %v2015_v28 }
 0x1c8   :  { %2365 = vst.msk [vmem:[%s4630_s3 + $0x178] sm:$0xf] %vm1345_vm1, %v1471_v29  ;;  %2522 = vst.msk [vmem:[%s4630_s3 + $0x2ec] sm:$0xf] %vm1345_vm1, %v2714_v27  ;;  %1031 = vmatprep.mubr.bf16.mxu1 %v634_v26  ;;  %2072 = vrot.lane.b32.xlu0 %v2713_v21, %s2773_s25 }
 0x1c9   :  { %1528 = vrot.lane.b32.xlu1 %v2650_v24, %s2773_s25  ;;  %1032 = vmatmul.mubr.bf16.gmra.mrb[104].mxu1 %v633_v23  ;;  %v556_v30 = vpop.f32.mrb[120].mxu0 }
 0x1ca   :  { %v2651_v31 = vpack.c.bf16 %v556_v30, %v556_v30  ;;  %v2017_v32 = vpop.permute.xlu0 %2016  ;;  %v1473_v33 = vpop.permute.xlu1 %1472 }
 0x1cb   :  { %2557 = vst.msk [vmem:[%s4630_s3 + $0x378] sm:$0xf] %vm1345_vm1, %v2017_v32  ;;  %2366 = vst.msk [vmem:[%s4630_s3 + $0x17c] sm:$0xf] %vm1345_vm1, %v1473_v33  ;;  %v558_v1 = vpop.f32.mrb[121].mxu0 }
 0x1cc   :  { %1406 = vst.msk [vmem:[%s4630_s3 + $0xf0] sm:$0xf] %vm1345_vm1, %v2651_v31  ;;  %v2715_v34 = vpack.c.bf16 %v558_v1, %v558_v1  ;;  %v560_v35 = vpop.f32.mrb[122].mxu0  ;;  %v825_v36 = vpop.f32.mrb[0].mxu1  ;;  %1530 = vrot.lane.b32.xlu0 %v2651_v31, %s2773_s25 }
 0x1cd   :  { %v635_v37 = vpack.c.bf16 %v560_v35, %v556_v30  ;;  %v2652_v38 = vpack.c.bf16 %v560_v35, %v560_v35  ;;  %1063 = vst.msk [vmem:[%s4631_s4 + $0x30] sm:$0xff] %vm1056_vm2, %v825_v36  ;;  %v827_v41 = vpop.f32.mrb[1].mxu1  ;;  %2074 = vrot.lane.b32.xlu1 %v2714_v27, %s2773_s25  ;;  %v562_v42 = vpop.f32.mrb[123].mxu0 }
 0x1ce   :  { %2523 = vst.msk [vmem:[%s4630_s3 + $0x2f0] sm:$0xf] %vm1345_vm1, %v2715_v34  ;;  %v636_v43 = vpack.c.bf16 %v562_v42, %v558_v1  ;;  %v2716_v46 = vpack.c.bf16 %v562_v42, %v562_v42  ;;  %v828_v49 = vpop.f32.mrb[2].mxu1  ;;  %v2019_v50 = vpop.permute.xlu1 %2018 }
 0x1cf   :  { %1407 = vst.msk [vmem:[%s4630_s3 + $0xf4] sm:$0xf] %vm1345_vm1, %v2652_v38  ;;  %v830_v40 = vpop.f32.mrb[3].mxu1  ;;  %2558 = vst.msk [vmem:[%s4630_s3 + $0x37c] sm:$0xf] %vm1345_vm1, %v2019_v50  ;;  %v1475_v47 = vpop.permute.xlu0 %1474 }
 0x1d0   :  { %1064 = vst.msk [vmem:[%s4631_s4 + $0x38] sm:$0xff] %vm1056_vm2, %v828_v49  ;;  %1039 = vmatprep.mubr.bf16.mxu1 %v636_v43  ;;  %2076 = vrot.lane.b32.xlu0 %v2715_v34, %s2773_s25 }
 0x1d1   :  { %2524 = vst.msk [vmem:[%s4630_s3 + $0x2f4] sm:$0xf] %vm1345_vm1, %v2716_v46  ;;  %2367 = vst.msk [vmem:[%s4630_s3 + $0x180] sm:$0xf] %vm1345_vm1, %v1475_v47  ;;  %1532 = vrot.lane.b32.xlu1 %v2652_v38, %s2773_s25  ;;  %1040 = vmatmul.mubr.bf16.gmra.mrb[108].mxu1 %v635_v37  ;;  %v566_v48 = vpop.f32.mrb[124].mxu0 }
 0x1d2   :  { %v2653_v51 = vpack.c.bf16 %v566_v48, %v566_v48  ;;  %v568_v53 = vpop.f32.mrb[125].mxu0 }
 0x1d3   :  { %v2021_v55 = vpop.permute.xlu0 %2020  ;;  %v1477_v39 = vpop.permute.xlu1 %1476  ;;  %v2717_v44 = vpack.c.bf16 %v568_v53, %v568_v53 }
 0x1d4   :  { %1408 = vst.msk [vmem:[%s4630_s3 + $0xf8] sm:$0xf] %vm1345_vm1, %v2653_v51  ;;  %2559 = vst.msk [vmem:[%s4630_s3 + $0x380] sm:$0xf] %vm1345_vm1, %v2021_v55  ;;  %v570_v45 = vpop.f32.mrb[126].mxu0  ;;  %v833_v56 = vpop.f32.mrb[4].mxu1  ;;  %1534 = vrot.lane.b32.xlu0 %v2653_v51, %s2773_s25 }
 0x1d5   :  { %2368 = vst.msk [vmem:[%s4630_s3 + $0x184] sm:$0xf] %vm1345_vm1, %v1477_v39  ;;  %2525 = vst.msk [vmem:[%s4630_s3 + $0x2f8] sm:$0xf] %vm1345_vm1, %v2717_v44  ;;  %v637_v54 = vpack.c.bf16 %v570_v45, %v566_v48  ;;  %v2654_v59 = vpack.c.bf16 %v570_v45, %v570_v45  ;;  %v835_v60 = vpop.f32.mrb[5].mxu1  ;;  %2078 = vrot.lane.b32.xlu1 %v2716_v46, %s2773_s25  ;;  %v572_v61 = vpop.f32.mrb[127].mxu0 }
 0x1d6   :  { %1065 = vst.msk [vmem:[%s4631_s4 + $0x40] sm:$0xff] %vm1056_vm2, %v833_v56  ;;  %v638_v62 = vpack.c.bf16 %v572_v61, %v568_v53  ;;  %v2718_v63 = vpack.c.bf16 %v572_v61, %v572_v61  ;;  %v836_v52 = vpop.f32.mrb[6].mxu1 }
 0x1d7   :  { %1409 = vst.msk [vmem:[%s4630_s3 + $0xfc] sm:$0xf] %vm1345_vm1, %v2654_v59  ;;  %v838_v57 = vpop.f32.mrb[7].mxu1  ;;  %v2023_v58 = vpop.permute.xlu1 %2022 }
 0x1d8   :  { %1066 = vst.msk [vmem:[%s4631_s4 + $0x48] sm:$0xff] %vm1056_vm2, %v836_v52  ;;  %v1479_v0 = vpop.permute.xlu0 %1478  ;;  %1047 = vmatprep.mubr.bf16.mxu1 %v638_v62  ;;  %2080 = vrot.lane.b32.xlu0 %v2717_v44, %s2773_s25 }
 0x1d9   :  { %2526 = vst.msk [vmem:[%s4630_s3 + $0x2fc] sm:$0xf] %vm1345_vm1, %v2718_v63  ;;  %2560 = vst.msk [vmem:[%s4630_s3 + $0x384] sm:$0xf] %vm1345_vm1, %v2023_v58  ;;  %1536 = vrot.lane.b32.xlu1 %v2654_v59, %s2773_s25  ;;  %1048 = vmatmul.mubr.bf16.gmra.mrb[112].mxu1 %v637_v54  ;;  %v801_v3 = vpop.f32.mrb[128].mxu0 }
 0x1da   :  { %2369 = vst.msk [vmem:[%s4630_s3 + $0x188] sm:$0xf] %vm1345_vm1, %v1479_v0  ;;  %v803_v4 = vpop.f32.mrb[129].mxu0 }
 0x1db   :  { %1057 = vst.msk [vmem:[%s4631_s4] sm:$0xff] %vm1056_vm2, %v801_v3  ;;  %v1481_v5 = vpop.permute.xlu1 %1480  ;;  %v804_v6 = vpop.f32.mrb[130].mxu0 }
 0x1dc   :  { %v2025_v9 = vpop.permute.xlu0 %2024  ;;  %2370 = vst.msk [vmem:[%s4630_s3 + $0x18c] sm:$0xf] %vm1345_vm1, %v1481_v5  ;;  %v841_v10 = vpop.f32.mrb[8].mxu1 }
 0x1dd   :  { %1058 = vst.msk [vmem:[%s4631_s4 + $0x8] sm:$0xff] %vm1056_vm2, %v804_v6  ;;  %1067 = vst.msk [vmem:[%s4631_s4 + $0x50] sm:$0xff] %vm1056_vm2, %v841_v10  ;;  %v843_v11 = vpop.f32.mrb[9].mxu1  ;;  %2082 = vrot.lane.b32.xlu1 %v2718_v63, %s2773_s25  ;;  %v806_v12 = vpop.f32.mrb[131].mxu0 }
 0x1de   :  { %2561 = vst.msk [vmem:[%s4630_s3 + $0x388] sm:$0xf] %vm1345_vm1, %v2025_v9  ;;  %v844_v2 = vpop.f32.mrb[10].mxu1 }
 0x1df   :  { %1068 = vst.msk [vmem:[%s4631_s4 + $0x58] sm:$0xff] %vm1056_vm2, %v844_v2  ;;  %v846_v7 = vpop.f32.mrb[11].mxu1  ;;  %v2027_v8 = vpop.permute.xlu1 %2026 }
 0x1e0   :  { %2562 = vst.msk [vmem:[%s4630_s3 + $0x38c] sm:$0xf] %vm1345_vm1, %v2027_v8  ;;  %v1483_v13 = vpop.permute.xlu0 %1482 }
 0x1e1   :  { %2371 = vst.msk [vmem:[%s4630_s3 + $0x190] sm:$0xf] %vm1345_vm1, %v1483_v13  ;;  %v809_v14 = vpop.f32.mrb[132].mxu0 }
 0x1e2   :  { %1059 = vst.msk [vmem:[%s4631_s4 + $0x10] sm:$0xff] %vm1056_vm2, %v809_v14  ;;  %v811_v15 = vpop.f32.mrb[133].mxu0 }
 0x1e3   :  { %v1485_v16 = vpop.permute.xlu1 %1484  ;;  %v812_v17 = vpop.f32.mrb[134].mxu0 }
 0x1e4   :  { %v2029_v18 = vpop.permute.xlu0 %2028  ;;  %2372 = vst.msk [vmem:[%s4630_s3 + $0x194] sm:$0xf] %vm1345_vm1, %v1485_v16  ;;  %v849_v19 = vpop.f32.mrb[12].mxu1 }
 0x1e5   :  { %1060 = vst.msk [vmem:[%s4631_s4 + $0x18] sm:$0xff] %vm1056_vm2, %v812_v17  ;;  %1069 = vst.msk [vmem:[%s4631_s4 + $0x60] sm:$0xff] %vm1056_vm2, %v849_v19  ;;  %v814_v20 = vpop.f32.mrb[135].mxu0  ;;  %v851_v21 = vpop.f32.mrb[13].mxu1 }
 0x1e6   :  { %2563 = vst.msk [vmem:[%s4630_s3 + $0x390] sm:$0xf] %vm1345_vm1, %v2029_v18  ;;  %v852_v22 = vpop.f32.mrb[14].mxu1 }
 0x1e7   :  { %1070 = vst.msk [vmem:[%s4631_s4 + $0x68] sm:$0xff] %vm1056_vm2, %v852_v22  ;;  %v854_v23 = vpop.f32.mrb[15].mxu1  ;;  %v2031_v24 = vpop.permute.xlu1 %2030 }
 0x1e8   :  { %2564 = vst.msk [vmem:[%s4630_s3 + $0x394] sm:$0xf] %vm1345_vm1, %v2031_v24  ;;  %v1487_v25 = vpop.permute.xlu0 %1486 }
 0x1e9   :  { %2373 = vst.msk [vmem:[%s4630_s3 + $0x198] sm:$0xf] %vm1345_vm1, %v1487_v25  ;;  %v817_v26 = vpop.f32.mrb[136].mxu0 }
 0x1ea   :  { %1061 = vst.msk [vmem:[%s4631_s4 + $0x20] sm:$0xff] %vm1056_vm2, %v817_v26  ;;  %v819_v27 = vpop.f32.mrb[137].mxu0 }
 0x1eb   :  { %v1489_v28 = vpop.permute.xlu1 %1488  ;;  %v820_v29 = vpop.f32.mrb[138].mxu0 }
 0x1ec   :  { %v2033_v30 = vpop.permute.xlu0 %2032  ;;  %2374 = vst.msk [vmem:[%s4630_s3 + $0x19c] sm:$0xf] %vm1345_vm1, %v1489_v28  ;;  %v857_v31 = vpop.f32.mrb[16].mxu1 }
 0x1ed   :  { %1062 = vst.msk [vmem:[%s4631_s4 + $0x28] sm:$0xff] %vm1056_vm2, %v820_v29  ;;  %1071 = vst.msk [vmem:[%s4631_s4 + $0x70] sm:$0xff] %vm1056_vm2, %v857_v31  ;;  %v822_v32 = vpop.f32.mrb[139].mxu0  ;;  %v859_v33 = vpop.f32.mrb[17].mxu1 }
 0x1ee   :  { %2565 = vst.msk [vmem:[%s4630_s3 + $0x398] sm:$0xf] %vm1345_vm1, %v2033_v30  ;;  %v860_v1 = vpop.f32.mrb[18].mxu1 }
 0x1ef   :  { %1072 = vst.msk [vmem:[%s4631_s4 + $0x78] sm:$0xff] %vm1056_vm2, %v860_v1  ;;  %v862_v34 = vpop.f32.mrb[19].mxu1  ;;  %v2035_v35 = vpop.permute.xlu1 %2034 }
 0x1f0   :  { %2566 = vst.msk [vmem:[%s4630_s3 + $0x39c] sm:$0xf] %vm1345_vm1, %v2035_v35  ;;  %v1491_v36 = vpop.permute.xlu0 %1490 }
 0x1f1   :  { %2375 = vst.msk [vmem:[%s4630_s3 + $0x1a0] sm:$0xf] %vm1345_vm1, %v1491_v36 }
 0x1f3   :  { %v1493_v37 = vpop.permute.xlu1 %1492 }
 0x1f4   :  { %v2037_v38 = vpop.permute.xlu0 %2036  ;;  %2376 = vst.msk [vmem:[%s4630_s3 + $0x1a4] sm:$0xf] %vm1345_vm1, %v1493_v37  ;;  %v865_v41 = vpop.f32.mrb[20].mxu1 }
 0x1f5   :  { %2567 = vst.msk [vmem:[%s4630_s3 + $0x3a0] sm:$0xf] %vm1345_vm1, %v2037_v38  ;;  %v867_v42 = vpop.f32.mrb[21].mxu1 }
 0x1f6   :  { %1073 = vst.msk [vmem:[%s4631_s4 + $0x80] sm:$0xff] %vm1056_vm2, %v865_v41  ;;  %v868_v43 = vpop.f32.mrb[22].mxu1 }
 0x1f7   :  { %1074 = vst.msk [vmem:[%s4631_s4 + $0x88] sm:$0xff] %vm1056_vm2, %v868_v43  ;;  %v870_v46 = vpop.f32.mrb[23].mxu1  ;;  %v2039_v49 = vpop.permute.xlu1 %2038 }
 0x1f8   :  { %2568 = vst.msk [vmem:[%s4630_s3 + $0x3a4] sm:$0xf] %vm1345_vm1, %v2039_v49  ;;  %v1495_v50 = vpop.permute.xlu0 %1494 }
 0x1f9   :  { %2377 = vst.msk [vmem:[%s4630_s3 + $0x1a8] sm:$0xf] %vm1345_vm1, %v1495_v50 }
 0x1fb   :  { %v1497_v40 = vpop.permute.xlu1 %1496 }
 0x1fc   :  { %v2041_v47 = vpop.permute.xlu0 %2040  ;;  %2378 = vst.msk [vmem:[%s4630_s3 + $0x1ac] sm:$0xf] %vm1345_vm1, %v1497_v40  ;;  %v873_v48 = vpop.f32.mrb[24].mxu1 }
 0x1fd   :  { %2569 = vst.msk [vmem:[%s4630_s3 + $0x3a8] sm:$0xf] %vm1345_vm1, %v2041_v47  ;;  %v875_v51 = vpop.f32.mrb[25].mxu1 }
 0x1fe   :  { %1075 = vst.msk [vmem:[%s4631_s4 + $0x90] sm:$0xff] %vm1056_vm2, %v873_v48  ;;  %v876_v53 = vpop.f32.mrb[26].mxu1 }
 0x1ff   :  { %1076 = vst.msk [vmem:[%s4631_s4 + $0x98] sm:$0xff] %vm1056_vm2, %v876_v53  ;;  %v878_v55 = vpop.f32.mrb[27].mxu1  ;;  %v2043_v39 = vpop.permute.xlu1 %2042 }
 0x200   :  { %2570 = vst.msk [vmem:[%s4630_s3 + $0x3ac] sm:$0xf] %vm1345_vm1, %v2043_v39  ;;  %v1499_v44 = vpop.permute.xlu0 %1498 }
 0x201   :  { %2379 = vst.msk [vmem:[%s4630_s3 + $0x1b0] sm:$0xf] %vm1345_vm1, %v1499_v44 }
 0x203   :  { %v1501_v45 = vpop.permute.xlu1 %1500 }
 0x204   :  { %v2045_v56 = vpop.permute.xlu0 %2044  ;;  %2380 = vst.msk [vmem:[%s4630_s3 + $0x1b4] sm:$0xf] %vm1345_vm1, %v1501_v45  ;;  %v881_v54 = vpop.f32.mrb[28].mxu1 }
 0x205   :  { %2571 = vst.msk [vmem:[%s4630_s3 + $0x3b0] sm:$0xf] %vm1345_vm1, %v2045_v56  ;;  %v883_v59 = vpop.f32.mrb[29].mxu1 }
 0x206   :  { %1077 = vst.msk [vmem:[%s4631_s4 + $0xa0] sm:$0xff] %vm1056_vm2, %v881_v54  ;;  %v884_v60 = vpop.f32.mrb[30].mxu1 }
 0x207   :  { %1078 = vst.msk [vmem:[%s4631_s4 + $0xa8] sm:$0xff] %vm1056_vm2, %v884_v60  ;;  %v886_v61 = vpop.f32.mrb[31].mxu1  ;;  %v2047_v62 = vpop.permute.xlu1 %2046 }
 0x208   :  { %2572 = vst.msk [vmem:[%s4630_s3 + $0x3b4] sm:$0xf] %vm1345_vm1, %v2047_v62  ;;  %v1503_v63 = vpop.permute.xlu0 %1502 }
 0x209   :  { %2381 = vst.msk [vmem:[%s4630_s3 + $0x1b8] sm:$0xf] %vm1345_vm1, %v1503_v63 }
 0x20b   :  { %v1505_v52 = vpop.permute.xlu1 %1504 }
 0x20c   :  { %v2049_v57 = vpop.permute.xlu0 %2048  ;;  %2382 = vst.msk [vmem:[%s4630_s3 + $0x1bc] sm:$0xf] %vm1345_vm1, %v1505_v52  ;;  %v889_v58 = vpop.f32.mrb[32].mxu1 }
 0x20d   :  { %2573 = vst.msk [vmem:[%s4630_s3 + $0x3b8] sm:$0xf] %vm1345_vm1, %v2049_v57  ;;  %v891_v0 = vpop.f32.mrb[33].mxu1 }
 0x20e   :  { %1079 = vst.msk [vmem:[%s4631_s4 + $0xb0] sm:$0xff] %vm1056_vm2, %v889_v58  ;;  %v892_v3 = vpop.f32.mrb[34].mxu1 }
 0x20f   :  { %1080 = vst.msk [vmem:[%s4631_s4 + $0xb8] sm:$0xff] %vm1056_vm2, %v892_v3  ;;  %v894_v4 = vpop.f32.mrb[35].mxu1  ;;  %v2051_v5 = vpop.permute.xlu1 %2050 }
 0x210   :  { %2574 = vst.msk [vmem:[%s4630_s3 + $0x3bc] sm:$0xf] %vm1345_vm1, %v2051_v5  ;;  %v1507_v6 = vpop.permute.xlu0 %1506 }
 0x211   :  { %2383 = vst.msk [vmem:[%s4630_s3 + $0x1c0] sm:$0xf] %vm1345_vm1, %v1507_v6 }
 0x213   :  { %v1509_v9 = vpop.permute.xlu1 %1508 }
 0x214   :  { %v2053_v10 = vpop.permute.xlu0 %2052  ;;  %2384 = vst.msk [vmem:[%s4630_s3 + $0x1c4] sm:$0xf] %vm1345_vm1, %v1509_v9  ;;  %v897_v11 = vpop.f32.mrb[36].mxu1 }
 0x215   :  { %2575 = vst.msk [vmem:[%s4630_s3 + $0x3c0] sm:$0xf] %vm1345_vm1, %v2053_v10  ;;  %v899_v12 = vpop.f32.mrb[37].mxu1 }
 0x216   :  { %1081 = vst.msk [vmem:[%s4631_s4 + $0xc0] sm:$0xff] %vm1056_vm2, %v897_v11  ;;  %v900_v2 = vpop.f32.mrb[38].mxu1 }
 0x217   :  { %1082 = vst.msk [vmem:[%s4631_s4 + $0xc8] sm:$0xff] %vm1056_vm2, %v900_v2  ;;  %v902_v7 = vpop.f32.mrb[39].mxu1  ;;  %v2055_v8 = vpop.permute.xlu1 %2054 }
 0x218   :  { %2576 = vst.msk [vmem:[%s4630_s3 + $0x3c4] sm:$0xf] %vm1345_vm1, %v2055_v8  ;;  %v1511_v13 = vpop.permute.xlu0 %1510 }
 0x219   :  { %2385 = vst.msk [vmem:[%s4630_s3 + $0x1c8] sm:$0xf] %vm1345_vm1, %v1511_v13 }
 0x21b   :  { %v1513_v14 = vpop.permute.xlu1 %1512 }
 0x21c   :  { %v2057_v15 = vpop.permute.xlu0 %2056  ;;  %2386 = vst.msk [vmem:[%s4630_s3 + $0x1cc] sm:$0xf] %vm1345_vm1, %v1513_v14  ;;  %v905_v16 = vpop.f32.mrb[40].mxu1 }
 0x21d   :  { %2577 = vst.msk [vmem:[%s4630_s3 + $0x3c8] sm:$0xf] %vm1345_vm1, %v2057_v15  ;;  %v907_v17 = vpop.f32.mrb[41].mxu1 }
 0x21e   :  { %1083 = vst.msk [vmem:[%s4631_s4 + $0xd0] sm:$0xff] %vm1056_vm2, %v905_v16  ;;  %v908_v18 = vpop.f32.mrb[42].mxu1 }
 0x21f   :  { %1084 = vst.msk [vmem:[%s4631_s4 + $0xd8] sm:$0xff] %vm1056_vm2, %v908_v18  ;;  %v910_v19 = vpop.f32.mrb[43].mxu1  ;;  %v2059_v20 = vpop.permute.xlu1 %2058 }
 0x220   :  { %2578 = vst.msk [vmem:[%s4630_s3 + $0x3cc] sm:$0xf] %vm1345_vm1, %v2059_v20  ;;  %v1515_v21 = vpop.permute.xlu0 %1514 }
 0x221   :  { %2387 = vst.msk [vmem:[%s4630_s3 + $0x1d0] sm:$0xf] %vm1345_vm1, %v1515_v21 }
 0x223   :  { %v1517_v22 = vpop.permute.xlu1 %1516 }
 0x224   :  { %v2061_v23 = vpop.permute.xlu0 %2060  ;;  %2388 = vst.msk [vmem:[%s4630_s3 + $0x1d4] sm:$0xf] %vm1345_vm1, %v1517_v22  ;;  %v913_v24 = vpop.f32.mrb[44].mxu1 }
 0x225   :  { %2579 = vst.msk [vmem:[%s4630_s3 + $0x3d0] sm:$0xf] %vm1345_vm1, %v2061_v23  ;;  %v915_v25 = vpop.f32.mrb[45].mxu1 }
 0x226   :  { %1085 = vst.msk [vmem:[%s4631_s4 + $0xe0] sm:$0xff] %vm1056_vm2, %v913_v24  ;;  %v916_v26 = vpop.f32.mrb[46].mxu1 }
 0x227   :  { %1086 = vst.msk [vmem:[%s4631_s4 + $0xe8] sm:$0xff] %vm1056_vm2, %v916_v26  ;;  %v918_v27 = vpop.f32.mrb[47].mxu1  ;;  %v2063_v28 = vpop.permute.xlu1 %2062 }
 0x228   :  { %2580 = vst.msk [vmem:[%s4630_s3 + $0x3d4] sm:$0xf] %vm1345_vm1, %v2063_v28  ;;  %v1519_v29 = vpop.permute.xlu0 %1518 }
 0x229   :  { %2389 = vst.msk [vmem:[%s4630_s3 + $0x1d8] sm:$0xf] %vm1345_vm1, %v1519_v29 }
 0x22b   :  { %v1521_v30 = vpop.permute.xlu1 %1520 }
 0x22c   :  { %v2065_v31 = vpop.permute.xlu0 %2064  ;;  %2390 = vst.msk [vmem:[%s4630_s3 + $0x1dc] sm:$0xf] %vm1345_vm1, %v1521_v30  ;;  %v921_v32 = vpop.f32.mrb[48].mxu1 }
 0x22d   :  { %2581 = vst.msk [vmem:[%s4630_s3 + $0x3d8] sm:$0xf] %vm1345_vm1, %v2065_v31  ;;  %v923_v33 = vpop.f32.mrb[49].mxu1 }
 0x22e   :  { %1087 = vst.msk [vmem:[%s4631_s4 + $0xf0] sm:$0xff] %vm1056_vm2, %v921_v32  ;;  %v924_v1 = vpop.f32.mrb[50].mxu1 }
 0x22f   :  { %1088 = vst.msk [vmem:[%s4631_s4 + $0xf8] sm:$0xff] %vm1056_vm2, %v924_v1  ;;  %v926_v34 = vpop.f32.mrb[51].mxu1  ;;  %v2067_v35 = vpop.permute.xlu1 %2066 }
 0x230   :  { %2582 = vst.msk [vmem:[%s4630_s3 + $0x3dc] sm:$0xf] %vm1345_vm1, %v2067_v35  ;;  %v1523_v36 = vpop.permute.xlu0 %1522 }
 0x231   :  { %2391 = vst.msk [vmem:[%s4630_s3 + $0x1e0] sm:$0xf] %vm1345_vm1, %v1523_v36 }
 0x233   :  { %v1525_v37 = vpop.permute.xlu1 %1524 }
 0x234   :  { %v2069_v38 = vpop.permute.xlu0 %2068  ;;  %2392 = vst.msk [vmem:[%s4630_s3 + $0x1e4] sm:$0xf] %vm1345_vm1, %v1525_v37  ;;  %v929_v41 = vpop.f32.mrb[52].mxu1 }
 0x235   :  { %2583 = vst.msk [vmem:[%s4630_s3 + $0x3e0] sm:$0xf] %vm1345_vm1, %v2069_v38  ;;  %v931_v42 = vpop.f32.mrb[53].mxu1 }
 0x236   :  { %1089 = vst.msk [vmem:[%s4631_s4 + $0x100] sm:$0xff] %vm1056_vm2, %v929_v41  ;;  %v932_v43 = vpop.f32.mrb[54].mxu1 }
 0x237   :  { %1090 = vst.msk [vmem:[%s4631_s4 + $0x108] sm:$0xff] %vm1056_vm2, %v932_v43  ;;  %v934_v46 = vpop.f32.mrb[55].mxu1  ;;  %v2071_v49 = vpop.permute.xlu1 %2070 }
 0x238   :  { %2584 = vst.msk [vmem:[%s4630_s3 + $0x3e4] sm:$0xf] %vm1345_vm1, %v2071_v49  ;;  %v1527_v50 = vpop.permute.xlu0 %1526 }
 0x239   :  { %2393 = vst.msk [vmem:[%s4630_s3 + $0x1e8] sm:$0xf] %vm1345_vm1, %v1527_v50 }
 0x23b   :  { %v1529_v40 = vpop.permute.xlu1 %1528 }
 0x23c   :  { %v2073_v47 = vpop.permute.xlu0 %2072  ;;  %2394 = vst.msk [vmem:[%s4630_s3 + $0x1ec] sm:$0xf] %vm1345_vm1, %v1529_v40  ;;  %v937_v48 = vpop.f32.mrb[56].mxu1 }
 0x23d   :  { %2585 = vst.msk [vmem:[%s4630_s3 + $0x3e8] sm:$0xf] %vm1345_vm1, %v2073_v47  ;;  %v939_v51 = vpop.f32.mrb[57].mxu1 }
 0x23e   :  { %1091 = vst.msk [vmem:[%s4631_s4 + $0x110] sm:$0xff] %vm1056_vm2, %v937_v48  ;;  %v940_v53 = vpop.f32.mrb[58].mxu1 }
 0x23f   :  { %1092 = vst.msk [vmem:[%s4631_s4 + $0x118] sm:$0xff] %vm1056_vm2, %v940_v53  ;;  %v942_v55 = vpop.f32.mrb[59].mxu1  ;;  %v2075_v39 = vpop.permute.xlu1 %2074 }
 0x240   :  { %2586 = vst.msk [vmem:[%s4630_s3 + $0x3ec] sm:$0xf] %vm1345_vm1, %v2075_v39  ;;  %v1531_v44 = vpop.permute.xlu0 %1530 }
 0x241   :  { %2395 = vst.msk [vmem:[%s4630_s3 + $0x1f0] sm:$0xf] %vm1345_vm1, %v1531_v44 }
 0x243   :  { %v1533_v45 = vpop.permute.xlu1 %1532 }
 0x244   :  { %v2077_v56 = vpop.permute.xlu0 %2076  ;;  %2396 = vst.msk [vmem:[%s4630_s3 + $0x1f4] sm:$0xf] %vm1345_vm1, %v1533_v45  ;;  %v945_v54 = vpop.f32.mrb[60].mxu1 }
 0x245   :  { %2587 = vst.msk [vmem:[%s4630_s3 + $0x3f0] sm:$0xf] %vm1345_vm1, %v2077_v56  ;;  %v947_v59 = vpop.f32.mrb[61].mxu1 }
 0x246   :  { %1093 = vst.msk [vmem:[%s4631_s4 + $0x120] sm:$0xff] %vm1056_vm2, %v945_v54  ;;  %v948_v60 = vpop.f32.mrb[62].mxu1 }
 0x247   :  { %1094 = vst.msk [vmem:[%s4631_s4 + $0x128] sm:$0xff] %vm1056_vm2, %v948_v60  ;;  %v950_v61 = vpop.f32.mrb[63].mxu1  ;;  %v2079_v62 = vpop.permute.xlu1 %2078 }
 0x248   :  { %2588 = vst.msk [vmem:[%s4630_s3 + $0x3f4] sm:$0xf] %vm1345_vm1, %v2079_v62  ;;  %v1535_v63 = vpop.permute.xlu0 %1534 }
 0x249   :  { %2397 = vst.msk [vmem:[%s4630_s3 + $0x1f8] sm:$0xf] %vm1345_vm1, %v1535_v63 }
 0x24b   :  { %v1537_v52 = vpop.permute.xlu1 %1536 }
 0x24c   :  { %v2081_v57 = vpop.permute.xlu0 %2080  ;;  %2398 = vst.msk [vmem:[%s4630_s3 + $0x1fc] sm:$0xf] %vm1345_vm1, %v1537_v52  ;;  %v953_v58 = vpop.f32.mrb[64].mxu1 }
 0x24d   :  { %2589 = vst.msk [vmem:[%s4630_s3 + $0x3f8] sm:$0xf] %vm1345_vm1, %v2081_v57  ;;  %v955_v0 = vpop.f32.mrb[65].mxu1 }
 0x24e   :  { %1095 = vst.msk [vmem:[%s4631_s4 + $0x130] sm:$0xff] %vm1056_vm2, %v953_v58  ;;  %v956_v3 = vpop.f32.mrb[66].mxu1 }
 0x24f   :  { %1096 = vst.msk [vmem:[%s4631_s4 + $0x138] sm:$0xff] %vm1056_vm2, %v956_v3  ;;  %v958_v4 = vpop.f32.mrb[67].mxu1  ;;  %v2083_v5 = vpop.permute.xlu1 %2082 }
 0x250   :  { %2590 = vst.msk [vmem:[%s4630_s3 + $0x3fc] sm:$0xf] %vm1345_vm1, %v2083_v5 }
 0x254   :  { %v961_v6 = vpop.f32.mrb[68].mxu1 }
 0x255   :  { %1097 = vst.msk [vmem:[%s4631_s4 + $0x140] sm:$0xff] %vm1056_vm2, %v961_v6  ;;  %v963_v9 = vpop.f32.mrb[69].mxu1 }
 0x256   :  { %v964_v10 = vpop.f32.mrb[70].mxu1 }
 0x257   :  { %1098 = vst.msk [vmem:[%s4631_s4 + $0x148] sm:$0xff] %vm1056_vm2, %v964_v10  ;;  %v966_v11 = vpop.f32.mrb[71].mxu1 }
 0x25c   :  { %v969_v12 = vpop.f32.mrb[72].mxu1 }
 0x25d   :  { %1099 = vst.msk [vmem:[%s4631_s4 + $0x150] sm:$0xff] %vm1056_vm2, %v969_v12  ;;  %v971_v2 = vpop.f32.mrb[73].mxu1 }
 0x25e   :  { %v972_v7 = vpop.f32.mrb[74].mxu1 }
 0x25f   :  { %1100 = vst.msk [vmem:[%s4631_s4 + $0x158] sm:$0xff] %vm1056_vm2, %v972_v7  ;;  %v974_v8 = vpop.f32.mrb[75].mxu1 }
 0x264   :  { %v977_v13 = vpop.f32.mrb[76].mxu1 }
 0x265   :  { %1101 = vst.msk [vmem:[%s4631_s4 + $0x160] sm:$0xff] %vm1056_vm2, %v977_v13  ;;  %v979_v14 = vpop.f32.mrb[77].mxu1 }
 0x266   :  { %v980_v15 = vpop.f32.mrb[78].mxu1 }
 0x267   :  { %1102 = vst.msk [vmem:[%s4631_s4 + $0x168] sm:$0xff] %vm1056_vm2, %v980_v15  ;;  %v982_v16 = vpop.f32.mrb[79].mxu1 }
 0x26c   :  { %v985_v17 = vpop.f32.mrb[80].mxu1 }
 0x26d   :  { %1103 = vst.msk [vmem:[%s4631_s4 + $0x170] sm:$0xff] %vm1056_vm2, %v985_v17  ;;  %v987_v18 = vpop.f32.mrb[81].mxu1 }
 0x26e   :  { %v988_v19 = vpop.f32.mrb[82].mxu1 }
 0x26f   :  { %1104 = vst.msk [vmem:[%s4631_s4 + $0x178] sm:$0xff] %vm1056_vm2, %v988_v19  ;;  %v990_v20 = vpop.f32.mrb[83].mxu1 }
 0x274   :  { %v993_v21 = vpop.f32.mrb[84].mxu1 }
 0x275   :  { %1105 = vst.msk [vmem:[%s4631_s4 + $0x180] sm:$0xff] %vm1056_vm2, %v993_v21  ;;  %v995_v22 = vpop.f32.mrb[85].mxu1 }
 0x276   :  { %v996_v23 = vpop.f32.mrb[86].mxu1 }
 0x277   :  { %1106 = vst.msk [vmem:[%s4631_s4 + $0x188] sm:$0xff] %vm1056_vm2, %v996_v23  ;;  %v998_v24 = vpop.f32.mrb[87].mxu1 }
 0x27c   :  { %v1001_v25 = vpop.f32.mrb[88].mxu1 }
 0x27d   :  { %1107 = vst.msk [vmem:[%s4631_s4 + $0x190] sm:$0xff] %vm1056_vm2, %v1001_v25  ;;  %v1003_v26 = vpop.f32.mrb[89].mxu1 }
 0x27e   :  { %v1004_v27 = vpop.f32.mrb[90].mxu1 }
 0x27f   :  { %1108 = vst.msk [vmem:[%s4631_s4 + $0x198] sm:$0xff] %vm1056_vm2, %v1004_v27  ;;  %v1006_v28 = vpop.f32.mrb[91].mxu1 }
 0x284   :  { %v1009_v29 = vpop.f32.mrb[92].mxu1 }
 0x285   :  { %1109 = vst.msk [vmem:[%s4631_s4 + $0x1a0] sm:$0xff] %vm1056_vm2, %v1009_v29  ;;  %v1011_v30 = vpop.f32.mrb[93].mxu1 }
 0x286   :  { %v1012_v31 = vpop.f32.mrb[94].mxu1 }
 0x287   :  { %1110 = vst.msk [vmem:[%s4631_s4 + $0x1a8] sm:$0xff] %vm1056_vm2, %v1012_v31  ;;  %v1014_v32 = vpop.f32.mrb[95].mxu1 }
 0x28c   :  { %v1017_v33 = vpop.f32.mrb[96].mxu1 }
 0x28d   :  { %1111 = vst.msk [vmem:[%s4631_s4 + $0x1b0] sm:$0xff] %vm1056_vm2, %v1017_v33  ;;  %v1019_v1 = vpop.f32.mrb[97].mxu1 }
 0x28e   :  { %v1020_v34 = vpop.f32.mrb[98].mxu1 }
 0x28f   :  { %1112 = vst.msk [vmem:[%s4631_s4 + $0x1b8] sm:$0xff] %vm1056_vm2, %v1020_v34  ;;  %v1022_v35 = vpop.f32.mrb[99].mxu1 }
 0x294   :  { %v1025_v36 = vpop.f32.mrb[100].mxu1 }
 0x295   :  { %1113 = vst.msk [vmem:[%s4631_s4 + $0x1c0] sm:$0xff] %vm1056_vm2, %v1025_v36  ;;  %v1027_v37 = vpop.f32.mrb[101].mxu1 }
 0x296   :  { %v1028_v38 = vpop.f32.mrb[102].mxu1 }
 0x297   :  { %1114 = vst.msk [vmem:[%s4631_s4 + $0x1c8] sm:$0xff] %vm1056_vm2, %v1028_v38  ;;  %v1030_v41 = vpop.f32.mrb[103].mxu1 }
 0x29c   :  { %v1033_v42 = vpop.f32.mrb[104].mxu1 }
 0x29d   :  { %1115 = vst.msk [vmem:[%s4631_s4 + $0x1d0] sm:$0xff] %vm1056_vm2, %v1033_v42  ;;  %v1035_v43 = vpop.f32.mrb[105].mxu1 }
 0x29e   :  { %v1036_v46 = vpop.f32.mrb[106].mxu1 }
 0x29f   :  { %1116 = vst.msk [vmem:[%s4631_s4 + $0x1d8] sm:$0xff] %vm1056_vm2, %v1036_v46  ;;  %v1038_v49 = vpop.f32.mrb[107].mxu1 }
 0x2a4   :  { %v1041_v50 = vpop.f32.mrb[108].mxu1 }
 0x2a5   :  { %1117 = vst.msk [vmem:[%s4631_s4 + $0x1e0] sm:$0xff] %vm1056_vm2, %v1041_v50  ;;  %v1043_v40 = vpop.f32.mrb[109].mxu1 }
 0x2a6   :  { %v1044_v47 = vpop.f32.mrb[110].mxu1 }
 0x2a7   :  { %1118 = vst.msk [vmem:[%s4631_s4 + $0x1e8] sm:$0xff] %vm1056_vm2, %v1044_v47  ;;  %v1046_v48 = vpop.f32.mrb[111].mxu1 }
 0x2ac   :  { %v1049_v51 = vpop.f32.mrb[112].mxu1 }
 0x2ad   :  { %1119 = vst.msk [vmem:[%s4631_s4 + $0x1f0] sm:$0xff] %vm1056_vm2, %v1049_v51  ;;  %v1051_v53 = vpop.f32.mrb[113].mxu1 }
 0x2ae   :  { %v1052_v55 = vpop.f32.mrb[114].mxu1 }
 0x2af   :  { %1120 = vst.msk [vmem:[%s4631_s4 + $0x1f8] sm:$0xff] %vm1056_vm2, %v1052_v55  ;;  %v1054_v39 = vpop.f32.mrb[115].mxu1 }

</bundles_post_ra>
